<compile_context>
chip_gen: v7x
topology: tpu7x:2x2x1
jax: 0.10.0
libtpu: 0.0.40
codegen_flags: <defaults>
</compile_context>

<pallas_src>
import functools

import jax
import jax.numpy as jnp
import numpy as np
from jax.experimental import pallas as pl
from jax.experimental.pallas import tpu as pltpu


def _rpn_head_kernel(x_ref, w3_ref, b3_ref, wh_ref, bh_ref, out_ref, *, th, w):
    # x_ref  : (1, 1, th+2, w+2, C)  padded NHWC row-tile (bf16)
    # w3_ref : (9, C, C)             3x3 conv weights, tap k = 3*dy+dx (bf16)
    # b3_ref : (1, C)                conv bias (f32)
    # wh_ref : (Kp, C)               fused (objectness | deltas) 1x1 weights (bf16)
    # bh_ref : (Kp, 1)               fused head bias (f32)
    # out_ref: (1, 1, Kp, th*w)      fused head logits, lane-dense (f32)
    c = w3_ref.shape[-1]
    m = th * w

    # 3x3 conv as 9 accumulated shifted matmuls (f32 accumulator).
    acc = jnp.zeros((m, c), jnp.float32)
    for dy in range(3):
        for dx in range(3):
            xs = x_ref[0, 0, dy:dy + th, dx:dx + w, :].reshape(m, c)
            acc += jnp.dot(xs, w3_ref[3 * dy + dx],
                           preferred_element_type=jnp.float32)

    # bias + ReLU, back to bf16 for the fused head matmul.
    t = jnp.maximum(acc + b3_ref[...], 0.0).astype(jnp.bfloat16)       # (m, C)

    # Fused 1x1 heads: (Kp, C) @ (C, m) -> (Kp, m); HW is the (large) lane dim.
    heads = jnp.dot(wh_ref[...], t.T, preferred_element_type=jnp.float32)
    out_ref[0, 0] = (heads + bh_ref[...]).astype(out_ref.dtype)


def _round_up(x, mult):
    return (x + mult - 1) // mult * mult


@functools.partial(jax.jit,
                   static_argnames=("num_anchors", "box_dim", "row_tile"))
def rpn_head_single_level(x_nchw, params, *, num_anchors, box_dim,
                          row_tile=None):
    """RPN head on one feature level. x_nchw: (N, C, H, W) float32.

    Returns (objectness (N, A, H, W), deltas (N, A*box_dim, H, W)).
    """
    N, C, H, W = x_nchw.shape
    A = num_anchors
    D = num_anchors * box_dim
    K = A + D
    Kp = _round_up(K, 8)                     # sublane-aligned fused head width

    # Row tiling: aim for ~1024 flattened rows of (TH*W, C) work per grid step.
    if row_tile is None:
        row_tile = max(1, min(H, 1024 // max(W, 1)))
    th = min(row_tile, H)
    num_tiles = pl.cdiv(H, th)
    h_pad = num_tiles * th
    m = th * W

    # --- glue: NCHW -> NHWC (bf16), pad H/W by 1, overlapping row windows ---
    x = jnp.transpose(x_nchw, (0, 2, 3, 1)).astype(jnp.bfloat16)    # (N,H,W,C)
    xp = jnp.pad(x, ((0, 0), (1, 1 + h_pad - H), (1, 1), (0, 0)))
    tiles = jnp.stack(
        [xp[:, i * th:i * th + th + 2] for i in range(num_tiles)],
        axis=1)                                       # (N, nt, th+2, W+2, C)

    # --- weights: 9 conv taps (cin,cout) bf16; fused/padded head (Kp,C) bf16 ---
    w3_k = params["w3"].reshape(9, C, C).astype(jnp.bfloat16)
    b3 = params["b3"].reshape(1, C).astype(jnp.float32)
    wh = jnp.concatenate([params["wo"], params["wd"]], axis=1)       # (C, K)
    wh = jnp.pad(wh, ((0, 0), (0, Kp - K))).T.astype(jnp.bfloat16)   # (Kp, C)
    bh = jnp.pad(jnp.concatenate([params["bo"], params["bd"]]),
                 (0, Kp - K)).reshape(Kp, 1).astype(jnp.float32)

    flops = 2 * N * num_tiles * m * C * (9 * C + Kp)
    bytes_accessed = (tiles.size * 2 + w3_k.size * 2 + wh.size * 2 +
                      b3.size * 4 + bh.size * 4 + N * num_tiles * Kp * m * 4)

    out = pl.pallas_call(
        functools.partial(_rpn_head_kernel, th=th, w=W),
        out_shape=jax.ShapeDtypeStruct((N, num_tiles, Kp, m), jnp.float32),
        grid_spec=pltpu.PrefetchScalarGridSpec(
            num_scalar_prefetch=0,
            grid=(N, num_tiles),
            in_specs=[
                pl.BlockSpec((1, 1, th + 2, W + 2, C),
                             lambda n, i: (n, i, 0, 0, 0)),
                pl.BlockSpec((9, C, C), lambda n, i: (0, 0, 0)),
                pl.BlockSpec((1, C), lambda n, i: (0, 0)),
                pl.BlockSpec((Kp, C), lambda n, i: (0, 0)),
                pl.BlockSpec((Kp, 1), lambda n, i: (0, 0)),
            ],
            out_specs=pl.BlockSpec((1, 1, Kp, m),
                                   lambda n, i: (n, i, 0, 0)),
        ),
        compiler_params=pltpu.CompilerParams(
            dimension_semantics=("parallel", "parallel")),
        cost_estimate=pl.CostEstimate(
            flops=flops, transcendentals=0, bytes_accessed=bytes_accessed),
    )(tiles, w3_k, b3, wh, bh)

    # glue: (N, nt, Kp, th*W) -> (N, Kp, H, W); split objectness / deltas.
    out = out.reshape(N, num_tiles, Kp, th, W)
    out = jnp.transpose(out, (0, 2, 1, 3, 4)).reshape(N, Kp, h_pad, W)
    out = out[:, :, :H, :]
    return out[:, :A], out[:, A:K]


def rpn_head_forward(features, params, *, num_anchors, box_dim, row_tile=None):
    """features: list of NCHW arrays (one per FPN level). Returns two lists."""
    pred_objectness_logits = []
    pred_anchor_deltas = []
    for x in features:
        obj, dlt = rpn_head_single_level(
            x, params, num_anchors=num_anchors, box_dim=box_dim,
            row_tile=row_tile)
        pred_objectness_logits.append(obj)
        pred_anchor_deltas.append(dlt)
    return pred_objectness_logits, pred_anchor_deltas


def _reference_single_level(x_nchw, params, num_anchors, box_dim):
    """Plain-JAX reference (lax.conv, f32) for a correctness spot-check."""
    w3_oihw = jnp.transpose(params["w3"], (3, 2, 0, 1))       # (Cout, Cin, 3, 3)
    t = jax.lax.conv_general_dilated(
        x_nchw, w3_oihw, window_strides=(1, 1), padding="SAME",
        dimension_numbers=("NCHW", "OIHW", "NCHW"))
    t = jax.nn.relu(t + params["b3"].reshape(1, -1, 1, 1))
    wo_oihw = jnp.transpose(params["wo"], (1, 0)).reshape(num_anchors, -1, 1, 1)
    wd_oihw = jnp.transpose(params["wd"], (1, 0)).reshape(
        num_anchors * box_dim, -1, 1, 1)
    obj = jax.lax.conv_general_dilated(
        t, wo_oihw, (1, 1), "VALID",
        dimension_numbers=("NCHW", "OIHW", "NCHW")) + params["bo"].reshape(1, -1, 1, 1)
    dlt = jax.lax.conv_general_dilated(
        t, wd_oihw, (1, 1), "VALID",
        dimension_numbers=("NCHW", "OIHW", "NCHW")) + params["bd"].reshape(1, -1, 1, 1)
    return obj, dlt


if __name__ == "__main__":
    in_channels = 64
    num_anchors = 3
    box_dim = 4
    batch = 2

    key = jax.random.PRNGKey(0)
    k_w3, k_wo, k_wd, k_x2, k_x3 = jax.random.split(key, 5)

    # nn.init.normal_(std=0.01) on weights, constant 0 on biases.
    params = {
        "w3": 0.01 * jax.random.normal(
            k_w3, (3, 3, in_channels, in_channels), jnp.float32),
        "b3": jnp.zeros((in_channels,), jnp.float32),
        "wo": 0.01 * jax.random.normal(
            k_wo, (in_channels, num_anchors), jnp.float32),
        "bo": jnp.zeros((num_anchors,), jnp.float32),
        "wd": 0.01 * jax.random.normal(
            k_wd, (in_channels, num_anchors * box_dim), jnp.float32),
        "bd": jnp.zeros((num_anchors * box_dim,), jnp.float32),
    }

    # Two FPN-like levels (different spatial sizes, same channels).
    features = [
        jax.random.normal(k_x2, (batch, in_channels, 16, 16), jnp.float32),
        jax.random.normal(k_x3, (batch, in_channels, 8, 8), jnp.float32),
    ]

    # row_tile=8 exercises the multi-row-tile grid on the 16x16 level.
    objs, dlts = rpn_head_forward(
        features, params, num_anchors=num_anchors, box_dim=box_dim, row_tile=8)
    jax.block_until_ready(objs)
    jax.block_until_ready(dlts)

    # Shape checks (PyTorch NCHW semantics).
    for x, o, d in zip(features, objs, dlts):
        N, C, H, W = x.shape
        assert o.shape == (N, num_anchors, H, W), o.shape
        assert d.shape == (N, num_anchors * box_dim, H, W), d.shape

    # Numerical spot-check against plain-JAX f32 conv reference
    # (kernel uses bf16 inputs with f32 accumulation).
    for x, o, d in zip(features, objs, dlts):
        o_ref, d_ref = _reference_single_level(x, params, num_anchors, box_dim)
        np.testing.assert_allclose(np.asarray(o), np.asarray(o_ref),
                                   atol=3e-3, rtol=3e-2)
        np.testing.assert_allclose(np.asarray(d), np.asarray(d_ref),
                                   atol=3e-3, rtol=3e-2)

    print("KERNEL_OK")
</pallas_src>

<mosaic_0001>
module attributes {stable_mosaic.version = 11 : i64} {
  func.func @_rpn_head_kernel(%arg0: i32, %arg1: i32, %arg2: memref<1x1x10x18x64xbf16, #tpu.memory_space<vmem>>, %arg3: memref<9x64x64xbf16, #tpu.memory_space<vmem>>, %arg4: memref<1x64xf32, #tpu.memory_space<vmem>>, %arg5: memref<16x64xbf16, #tpu.memory_space<vmem>>, %arg6: memref<16x1xf32, #tpu.memory_space<vmem>>, %arg7: memref<1x1x16x128xf32, #tpu.memory_space<vmem>>) attributes {dimension_semantics = [#tpu.dimension_semantics<parallel>, #tpu.dimension_semantics<parallel>], iteration_bounds = array<i64: 2, 2>, scalar_prefetch = 0 : i64, scratch_operands = 0 : i64, tpu.core_type = #tpu.core_type<tc>, window_params = [{transform_indices = @transform_0, window_bounds = array<i64: 1, 1, 10, 18, 64>}, {pipeline_mode = #tpu.pipeline_mode<synchronous>, transform_indices = @transform_1, window_bounds = array<i64: 9, 64, 64>}, {pipeline_mode = #tpu.pipeline_mode<synchronous>, transform_indices = @transform_2, window_bounds = array<i64: 1, 64>}, {pipeline_mode = #tpu.pipeline_mode<synchronous>, transform_indices = @transform_3, window_bounds = array<i64: 16, 64>}, {pipeline_mode = #tpu.pipeline_mode<synchronous>, transform_indices = @transform_4, window_bounds = array<i64: 16, 1>}, {transform_indices = @transform_5, window_bounds = array<i64: 1, 1, 16, 128>}]} {
    %cst = arith.constant 0.000000e+00 : f32
    %0 = vector.broadcast %cst : f32 to vector<128x64xf32>
    %c0 = arith.constant 0 : index
    %c0_0 = arith.constant 0 : index
    %c0_1 = arith.constant 0 : index
    %c0_2 = arith.constant 0 : index
    %c0_3 = arith.constant 0 : index
    %1 = vector.load %arg2[%c0, %c0_0, %c0_1, %c0_2, %c0_3] : memref<1x1x10x18x64xbf16, #tpu.memory_space<vmem>>, vector<1x1x8x16x64xbf16>
    %2 = vector.shape_cast %1 : vector<1x1x8x16x64xbf16> to vector<8x16x64xbf16>
    %3 = vector.shape_cast %2 : vector<8x16x64xbf16> to vector<128x64xbf16>
    %c0_4 = arith.constant 0 : index
    %c0_5 = arith.constant 0 : index
    %c0_6 = arith.constant 0 : index
    %4 = vector.load %arg3[%c0_4, %c0_5, %c0_6] : memref<9x64x64xbf16, #tpu.memory_space<vmem>>, vector<1x64x64xbf16>
    %5 = vector.shape_cast %4 : vector<1x64x64xbf16> to vector<64x64xbf16>
    %cst_7 = arith.constant dense<0.000000e+00> : vector<128x64xf32>
    %6 = tpu.matmul %3, %5, %cst_7 {dimension_numbers = #tpu.dot_dimension_numbers<[1], [0], [0], [1], [0, 0, 1, 1], [], []>} : vector<128x64xbf16>, vector<64x64xbf16>, vector<128x64xf32> -> vector<128x64xf32>
    %7 = arith.addf %0, %6 : vector<128x64xf32>
    %c0_8 = arith.constant 0 : index
    %c0_9 = arith.constant 0 : index
    %c0_10 = arith.constant 0 : index
    %c1 = arith.constant 1 : index
    %c0_11 = arith.constant 0 : index
    %8 = vector.load %arg2[%c0_8, %c0_9, %c0_10, %c1, %c0_11] : memref<1x1x10x18x64xbf16, #tpu.memory_space<vmem>>, vector<1x1x8x16x64xbf16>
    %9 = vector.shape_cast %8 : vector<1x1x8x16x64xbf16> to vector<8x16x64xbf16>
    %10 = vector.shape_cast %9 : vector<8x16x64xbf16> to vector<128x64xbf16>
    %c1_12 = arith.constant 1 : index
    %c0_13 = arith.constant 0 : index
    %c0_14 = arith.constant 0 : index
    %11 = vector.load %arg3[%c1_12, %c0_13, %c0_14] : memref<9x64x64xbf16, #tpu.memory_space<vmem>>, vector<1x64x64xbf16>
    %12 = vector.shape_cast %11 : vector<1x64x64xbf16> to vector<64x64xbf16>
    %cst_15 = arith.constant dense<0.000000e+00> : vector<128x64xf32>
    %13 = tpu.matmul %10, %12, %cst_15 {dimension_numbers = #tpu.dot_dimension_numbers<[1], [0], [0], [1], [0, 0, 1, 1], [], []>} : vector<128x64xbf16>, vector<64x64xbf16>, vector<128x64xf32> -> vector<128x64xf32>
    %14 = arith.addf %7, %13 : vector<128x64xf32>
    %c0_16 = arith.constant 0 : index
    %c0_17 = arith.constant 0 : index
    %c0_18 = arith.constant 0 : index
    %c2 = arith.constant 2 : index
    %c0_19 = arith.constant 0 : index
    %15 = vector.load %arg2[%c0_16, %c0_17, %c0_18, %c2, %c0_19] : memref<1x1x10x18x64xbf16, #tpu.memory_space<vmem>>, vector<1x1x8x16x64xbf16>
    %16 = vector.shape_cast %15 : vector<1x1x8x16x64xbf16> to vector<8x16x64xbf16>
    %17 = vector.shape_cast %16 : vector<8x16x64xbf16> to vector<128x64xbf16>
    %c2_20 = arith.constant 2 : index
    %c0_21 = arith.constant 0 : index
    %c0_22 = arith.constant 0 : index
    %18 = vector.load %arg3[%c2_20, %c0_21, %c0_22] : memref<9x64x64xbf16, #tpu.memory_space<vmem>>, vector<1x64x64xbf16>
    %19 = vector.shape_cast %18 : vector<1x64x64xbf16> to vector<64x64xbf16>
    %cst_23 = arith.constant dense<0.000000e+00> : vector<128x64xf32>
    %20 = tpu.matmul %17, %19, %cst_23 {dimension_numbers = #tpu.dot_dimension_numbers<[1], [0], [0], [1], [0, 0, 1, 1], [], []>} : vector<128x64xbf16>, vector<64x64xbf16>, vector<128x64xf32> -> vector<128x64xf32>
    %21 = arith.addf %14, %20 : vector<128x64xf32>
    %c0_24 = arith.constant 0 : index
    %c0_25 = arith.constant 0 : index
    %c1_26 = arith.constant 1 : index
    %c0_27 = arith.constant 0 : index
    %c0_28 = arith.constant 0 : index
    %22 = vector.load %arg2[%c0_24, %c0_25, %c1_26, %c0_27, %c0_28] : memref<1x1x10x18x64xbf16, #tpu.memory_space<vmem>>, vector<1x1x8x16x64xbf16>
    %23 = vector.shape_cast %22 : vector<1x1x8x16x64xbf16> to vector<8x16x64xbf16>
    %24 = vector.shape_cast %23 : vector<8x16x64xbf16> to vector<128x64xbf16>
    %c3 = arith.constant 3 : index
    %c0_29 = arith.constant 0 : index
    %c0_30 = arith.constant 0 : index
    %25 = vector.load %arg3[%c3, %c0_29, %c0_30] : memref<9x64x64xbf16, #tpu.memory_space<vmem>>, vector<1x64x64xbf16>
    %26 = vector.shape_cast %25 : vector<1x64x64xbf16> to vector<64x64xbf16>
    %cst_31 = arith.constant dense<0.000000e+00> : vector<128x64xf32>
    %27 = tpu.matmul %24, %26, %cst_31 {dimension_numbers = #tpu.dot_dimension_numbers<[1], [0], [0], [1], [0, 0, 1, 1], [], []>} : vector<128x64xbf16>, vector<64x64xbf16>, vector<128x64xf32> -> vector<128x64xf32>
    %28 = arith.addf %21, %27 : vector<128x64xf32>
    %c0_32 = arith.constant 0 : index
    %c0_33 = arith.constant 0 : index
    %c1_34 = arith.constant 1 : index
    %c1_35 = arith.constant 1 : index
    %c0_36 = arith.constant 0 : index
    %29 = vector.load %arg2[%c0_32, %c0_33, %c1_34, %c1_35, %c0_36] : memref<1x1x10x18x64xbf16, #tpu.memory_space<vmem>>, vector<1x1x8x16x64xbf16>
    %30 = vector.shape_cast %29 : vector<1x1x8x16x64xbf16> to vector<8x16x64xbf16>
    %31 = vector.shape_cast %30 : vector<8x16x64xbf16> to vector<128x64xbf16>
    %c4 = arith.constant 4 : index
    %c0_37 = arith.constant 0 : index
    %c0_38 = arith.constant 0 : index
    %32 = vector.load %arg3[%c4, %c0_37, %c0_38] : memref<9x64x64xbf16, #tpu.memory_space<vmem>>, vector<1x64x64xbf16>
    %33 = vector.shape_cast %32 : vector<1x64x64xbf16> to vector<64x64xbf16>
    %cst_39 = arith.constant dense<0.000000e+00> : vector<128x64xf32>
    %34 = tpu.matmul %31, %33, %cst_39 {dimension_numbers = #tpu.dot_dimension_numbers<[1], [0], [0], [1], [0, 0, 1, 1], [], []>} : vector<128x64xbf16>, vector<64x64xbf16>, vector<128x64xf32> -> vector<128x64xf32>
    %35 = arith.addf %28, %34 : vector<128x64xf32>
    %c0_40 = arith.constant 0 : index
    %c0_41 = arith.constant 0 : index
    %c1_42 = arith.constant 1 : index
    %c2_43 = arith.constant 2 : index
    %c0_44 = arith.constant 0 : index
    %36 = vector.load %arg2[%c0_40, %c0_41, %c1_42, %c2_43, %c0_44] : memref<1x1x10x18x64xbf16, #tpu.memory_space<vmem>>, vector<1x1x8x16x64xbf16>
    %37 = vector.shape_cast %36 : vector<1x1x8x16x64xbf16> to vector<8x16x64xbf16>
    %38 = vector.shape_cast %37 : vector<8x16x64xbf16> to vector<128x64xbf16>
    %c5 = arith.constant 5 : index
    %c0_45 = arith.constant 0 : index
    %c0_46 = arith.constant 0 : index
    %39 = vector.load %arg3[%c5, %c0_45, %c0_46] : memref<9x64x64xbf16, #tpu.memory_space<vmem>>, vector<1x64x64xbf16>
    %40 = vector.shape_cast %39 : vector<1x64x64xbf16> to vector<64x64xbf16>
    %cst_47 = arith.constant dense<0.000000e+00> : vector<128x64xf32>
    %41 = tpu.matmul %38, %40, %cst_47 {dimension_numbers = #tpu.dot_dimension_numbers<[1], [0], [0], [1], [0, 0, 1, 1], [], []>} : vector<128x64xbf16>, vector<64x64xbf16>, vector<128x64xf32> -> vector<128x64xf32>
    %42 = arith.addf %35, %41 : vector<128x64xf32>
    %c0_48 = arith.constant 0 : index
    %c0_49 = arith.constant 0 : index
    %c2_50 = arith.constant 2 : index
    %c0_51 = arith.constant 0 : index
    %c0_52 = arith.constant 0 : index
    %43 = vector.load %arg2[%c0_48, %c0_49, %c2_50, %c0_51, %c0_52] : memref<1x1x10x18x64xbf16, #tpu.memory_space<vmem>>, vector<1x1x8x16x64xbf16>
    %44 = vector.shape_cast %43 : vector<1x1x8x16x64xbf16> to vector<8x16x64xbf16>
    %45 = vector.shape_cast %44 : vector<8x16x64xbf16> to vector<128x64xbf16>
    %c6 = arith.constant 6 : index
    %c0_53 = arith.constant 0 : index
    %c0_54 = arith.constant 0 : index
    %46 = vector.load %arg3[%c6, %c0_53, %c0_54] : memref<9x64x64xbf16, #tpu.memory_space<vmem>>, vector<1x64x64xbf16>
    %47 = vector.shape_cast %46 : vector<1x64x64xbf16> to vector<64x64xbf16>
    %cst_55 = arith.constant dense<0.000000e+00> : vector<128x64xf32>
    %48 = tpu.matmul %45, %47, %cst_55 {dimension_numbers = #tpu.dot_dimension_numbers<[1], [0], [0], [1], [0, 0, 1, 1], [], []>} : vector<128x64xbf16>, vector<64x64xbf16>, vector<128x64xf32> -> vector<128x64xf32>
    %49 = arith.addf %42, %48 : vector<128x64xf32>
    %c0_56 = arith.constant 0 : index
    %c0_57 = arith.constant 0 : index
    %c2_58 = arith.constant 2 : index
    %c1_59 = arith.constant 1 : index
    %c0_60 = arith.constant 0 : index
    %50 = vector.load %arg2[%c0_56, %c0_57, %c2_58, %c1_59, %c0_60] : memref<1x1x10x18x64xbf16, #tpu.memory_space<vmem>>, vector<1x1x8x16x64xbf16>
    %51 = vector.shape_cast %50 : vector<1x1x8x16x64xbf16> to vector<8x16x64xbf16>
    %52 = vector.shape_cast %51 : vector<8x16x64xbf16> to vector<128x64xbf16>
    %c7 = arith.constant 7 : index
    %c0_61 = arith.constant 0 : index
    %c0_62 = arith.constant 0 : index
    %53 = vector.load %arg3[%c7, %c0_61, %c0_62] : memref<9x64x64xbf16, #tpu.memory_space<vmem>>, vector<1x64x64xbf16>
    %54 = vector.shape_cast %53 : vector<1x64x64xbf16> to vector<64x64xbf16>
    %cst_63 = arith.constant dense<0.000000e+00> : vector<128x64xf32>
    %55 = tpu.matmul %52, %54, %cst_63 {dimension_numbers = #tpu.dot_dimension_numbers<[1], [0], [0], [1], [0, 0, 1, 1], [], []>} : vector<128x64xbf16>, vector<64x64xbf16>, vector<128x64xf32> -> vector<128x64xf32>
    %56 = arith.addf %49, %55 : vector<128x64xf32>
    %c0_64 = arith.constant 0 : index
    %c0_65 = arith.constant 0 : index
    %c2_66 = arith.constant 2 : index
    %c2_67 = arith.constant 2 : index
    %c0_68 = arith.constant 0 : index
    %57 = vector.load %arg2[%c0_64, %c0_65, %c2_66, %c2_67, %c0_68] : memref<1x1x10x18x64xbf16, #tpu.memory_space<vmem>>, vector<1x1x8x16x64xbf16>
    %58 = vector.shape_cast %57 : vector<1x1x8x16x64xbf16> to vector<8x16x64xbf16>
    %59 = vector.shape_cast %58 : vector<8x16x64xbf16> to vector<128x64xbf16>
    %c8 = arith.constant 8 : index
    %c0_69 = arith.constant 0 : index
    %c0_70 = arith.constant 0 : index
    %60 = vector.load %arg3[%c8, %c0_69, %c0_70] : memref<9x64x64xbf16, #tpu.memory_space<vmem>>, vector<1x64x64xbf16>
    %61 = vector.shape_cast %60 : vector<1x64x64xbf16> to vector<64x64xbf16>
    %cst_71 = arith.constant dense<0.000000e+00> : vector<128x64xf32>
    %62 = tpu.matmul %59, %61, %cst_71 {dimension_numbers = #tpu.dot_dimension_numbers<[1], [0], [0], [1], [0, 0, 1, 1], [], []>} : vector<128x64xbf16>, vector<64x64xbf16>, vector<128x64xf32> -> vector<128x64xf32>
    %63 = arith.addf %56, %62 : vector<128x64xf32>
    %c0_72 = arith.constant 0 : index
    %c0_73 = arith.constant 0 : index
    %64 = vector.load %arg4[%c0_72, %c0_73] : memref<1x64xf32, #tpu.memory_space<vmem>>, vector<1x64xf32>
    %65 = vector.broadcast %64 : vector<1x64xf32> to vector<128x64xf32>
    %66 = arith.addf %63, %65 : vector<128x64xf32>
    %cst_74 = arith.constant 0.000000e+00 : f32
    %67 = vector.broadcast %cst_74 : f32 to vector<128x64xf32>
    %68 = arith.maximumf %66, %67 : vector<128x64xf32>
    %69 = arith.truncf %68 : vector<128x64xf32> to vector<128x64xbf16>
    %c0_75 = arith.constant 0 : index
    %c0_76 = arith.constant 0 : index
    %70 = vector.load %arg5[%c0_75, %c0_76] : memref<16x64xbf16, #tpu.memory_space<vmem>>, vector<16x64xbf16>
    %71 = tpu.transpose %69, [1, 0] : vector<128x64xbf16> -> vector<64x128xbf16>
    %cst_77 = arith.constant dense<0.000000e+00> : vector<16x128xf32>
    %72 = tpu.matmul %70, %71, %cst_77 {dimension_numbers = #tpu.dot_dimension_numbers<[1], [0], [0], [1], [0, 0, 1, 1], [], []>} : vector<16x64xbf16>, vector<64x128xbf16>, vector<16x128xf32> -> vector<16x128xf32>
    %c0_78 = arith.constant 0 : index
    %c0_79 = arith.constant 0 : index
    %73 = vector.load %arg6[%c0_78, %c0_79] : memref<16x1xf32, #tpu.memory_space<vmem>>, vector<16x1xf32>
    %74 = vector.broadcast %73 : vector<16x1xf32> to vector<16x128xf32>
    %75 = arith.addf %72, %74 : vector<16x128xf32>
    %c0_80 = arith.constant 0 : index
    %c0_81 = arith.constant 0 : index
    %c0_82 = arith.constant 0 : index
    %c0_83 = arith.constant 0 : index
    %76 = vector.load %arg7[%c0_80, %c0_81, %c0_82, %c0_83] : memref<1x1x16x128xf32, #tpu.memory_space<vmem>>, vector<1x1x16x128xf32>
    %77 = vector.shape_cast %76 : vector<1x1x16x128xf32> to vector<16x128xf32>
    %78 = vector.shape_cast %75 : vector<16x128xf32> to vector<1x1x16x128xf32>
    tpu.vector_store %arg7[%c0_80, %c0_81, %c0_82, %c0_83], %78 {strides = array<i32>} : memref<1x1x16x128xf32, #tpu.memory_space<vmem>>, vector<1x1x16x128xf32>,
    return
  }
  func.func @transform_0(%arg0: i32, %arg1: i32) -> (i32, i32, i32, i32, i32) {
    %c0_i32 = arith.constant 0 : i32
    %c0_i32_0 = arith.constant 0 : i32
    %c0_i32_1 = arith.constant 0 : i32
    %c0_i32_2 = arith.constant 0 : i32
    return %arg0, %arg1, %c0_i32, %c0_i32_0, %c0_i32_1 : i32, i32, i32, i32, i32
  }
  func.func @transform_1(%arg0: i32, %arg1: i32) -> (i32, i32, i32) {
    %c0_i32 = arith.constant 0 : i32
    %c0_i32_0 = arith.constant 0 : i32
    %c0_i32_1 = arith.constant 0 : i32
    %c0_i32_2 = arith.constant 0 : i32
    return %c0_i32, %c0_i32_0, %c0_i32_1 : i32, i32, i32
  }
  func.func @transform_2(%arg0: i32, %arg1: i32) -> (i32, i32) {
    %c0_i32 = arith.constant 0 : i32
    %c0_i32_0 = arith.constant 0 : i32
    %c0_i32_1 = arith.constant 0 : i32
    return %c0_i32, %c0_i32_0 : i32, i32
  }
  func.func @transform_3(%arg0: i32, %arg1: i32) -> (i32, i32) {
    %c0_i32 = arith.constant 0 : i32
    %c0_i32_0 = arith.constant 0 : i32
    %c0_i32_1 = arith.constant 0 : i32
    return %c0_i32, %c0_i32_0 : i32, i32
  }
  func.func @transform_4(%arg0: i32, %arg1: i32) -> (i32, i32) {
    %c0_i32 = arith.constant 0 : i32
    %c0_i32_0 = arith.constant 0 : i32
    %c0_i32_1 = arith.constant 0 : i32
    return %c0_i32, %c0_i32_0 : i32, i32
  }
  func.func @transform_5(%arg0: i32, %arg1: i32) -> (i32, i32, i32, i32) {
    %c0_i32 = arith.constant 0 : i32
    %c0_i32_0 = arith.constant 0 : i32
    %c0_i32_1 = arith.constant 0 : i32
    return %arg0, %arg1, %c0_i32, %c0_i32_0 : i32, i32, i32, i32
  }
}

</mosaic_0001>

<bundles_post_ra>
// kernel: rpn_head_single_level.1
= control target key start
LH: loop header
LB: loop body
LE: loop exit
PB: predicated region body
PF: predicated region fallthrough
CT: control target
= control target key end

     0   :  { %s4241_s18 = smov 0   ;;  %s4243_s19 = smov 0   ;;  %s5288_s0 = inlined_call_operand.vmem [shape: bf16[2,2,10,18,64], index: 0, kind: input, shape index: {}]   ;;  %s5289_s1 = inlined_call_operand.vmem [shape: bf16[9,64,64], index: 1, kind: input, shape index: {}]   ;;  %s5290_s2 = inlined_call_operand.vmem [shape: f32[1,64], index: 2, kind: input, shape index: {}]   ;;  %s5291_s3 = inlined_call_operand.vmem [shape: bf16[16,64], index: 3, kind: input, shape index: {}]   ;;  %s5292_s4 = inlined_call_operand.vmem [shape: f32[16,1], index: 4, kind: input, shape index: {}]   ;;  %s5293_s5 = inlined_call_operand.vmem [shape: f32[2,2,16,128], index: 5, kind: output, shape index: {}]  }
   0x1   :  { %s4245_s20 = smov 0   ;;  %s4247_s21 = smov 0  }
   0x2   :  { %s4249_s22 = smov 0  }
   0x3 LB: > { %s24_s23 = sadd.s32 1, %s4198_s20  ;;  %s27_s24 = sadd.s32 1, %s4202_s21  ;;  %s4206_s22 = sphi %s4249_s22, %s15_s22   ;;  %s4202_s21 = sphi %s4247_s21, %s5320_s21   ;;  %s4198_s20 = sphi %s4245_s20, %s5319_s20   ;;  %s4194_s19 = sphi %s4243_s19, %s5318_s19   ;;  %s4190_s18 = sphi %s4241_s18, %s5317_s18  }
   0x4   : > { %p25_p0 = scmp.ge.s32.totalorder %s24_s23, 2  ;;  %p3203_p1 = scmp.ge.s32.totalorder %s4206_s22, 1 }
   0x5   : > { %p207_p2 = scmp.lt.s32.totalorder %s4206_s22, 5 }
   0x6   : > { %s5322_s23 = smov (%p25_p0, %s24_s23), 0  ;;  %s5324_s24 = smov (!%p25_p0, %s27_s24), %s4202_s21 }
   0x7   : > { %p208_p3 = pnand %p3203_p1, %p207_p2  ;;  %p29_p4 = scmp.ge.s32.totalorder %s5324_s24, 2 }
   0x9   : > { %s5326_s24 = smov (%p29_p4, %s5324_s24), 0  ;;  %211 = sbr.rel (%p208_p3) target bundleno = 708 (0x2c4), region = 40 }
  0x10   : > { %v4104_v0 = vld [vmem:[%s5289_s1 + $0x80] sm:$0xff]   ;;  %p243_p5 = scmp.lt.s32.totalorder %s4194_s19, 1  ;;  %p245_p6 = scmp.lt.s32.totalorder %s4190_s18, 1  ;;  %v4106_v2 = vld [vmem:[%s5289_s1 + $0x88] sm:$0xff]   ;;  %v4108_v4 = vld [vmem:[%s5289_s1 + $0x90] sm:$0xff]   ;;  %vm546_vm3 = vcmask 523264  }
  0x11   : > { %v4105_v1 = vld [vmem:[%s5289_s1 + $0x20] sm:$0xff]   ;;  %3790 = vmatprep.subr.bf16.mxu0 %v4104_v0  ;;  %v4107_v3 = vld [vmem:[%s5289_s1 + $0x28] sm:$0xff]   ;;  %v4109_v5 = vld [vmem:[%s5289_s1 + $0x30] sm:$0xff]   ;;  %vm294_vm0 = vsmask.f32 3328  ;;  %vm877_vm4 = vcmask 1042432  }
  0x12   : > { %s5328_s19 = smov (!%p243_p5, %s4194_s19), 1  ;;  %3694 = vmatprep.subr.bf16.mxu1 %v4105_v1  ;;  %3791 = vmatpush3.bf16.msra.mxu0 %v4104_v0  ;;  %s5330_s18 = smov (!%p245_p6, %s4190_s18), 1  ;;  %v4110_v6 = vld [vmem:[%s5289_s1 + $0x98] sm:$0xff]   ;;  %vm295_vm1 = vsmask.f32 7440  ;;  %v4330_v19 = vld [vmem:[%s5289_s1 + $0xa0] sm:$0xff]  }
  0x13   : > { %3695 = vmatpush3.bf16.msra.mxu1 %v4105_v1  ;;  %3792 = vmatprep.subr.bf16.mxu0 %v4106_v2  ;;  %s4059_s10 = smul.u32 60, %s5328_s19  ;;  %v4111_v7 = vld [vmem:[%s5289_s1 + $0x38] sm:$0xff]   ;;  %vm4340_vm2 = vmor %vm294_vm0, %vm295_vm1  ;;  %v4362_v55 = vld [vmem:[%s5289_s1] sm:$0xff]   ;;  %vm878_vm5 = vcmask 1046532   ;;  %vm4209_vm7 = vmmov 0   ;;  %s3205_s17 = sshll.u32 %s5330_s18, 1 }
  0x14   : > { %3696 = vmatprep.subr.bf16.mxu1 %v4107_v3  ;;  %s4058_s13 = smul.u32 30, %s5330_s18  ;;  %vm4620_vm6 = vmor %vm877_vm4, %vm878_vm5  ;;  %s3206_s25 = sshll.u32 %s5328_s19, 2 }
  0x16   : > { %3793 = vmatpush3.bf16.msra.mxu0 %v4106_v2  ;;  %s249_s14 = sadd.s32 %s4059_s10, %s4058_s13 }
  0x17   : > { %3697 = vmatpush3.bf16.msra.mxu1 %v4107_v3  ;;  %3794 = vmatprep.subr.bf16.mxu0 %v4108_v4  ;;  %s3204_s26 = sshll.u32 %s249_s14, 2 }
  0x18   : > { %3698 = vmatprep.subr.bf16.mxu1 %v4109_v5  ;;  %s4304_s29 = scalar_lea.vmem %s5288_s0, %s3204_s26  ;;  %s258_s26 = sadd.s32 %s3206_s25, %s3205_s17 }
  0x19   : > { %v4307_v8 = vld [vmem:[%s4304_s29] sm:$0xf]  ;;  %v4310_v9 = vld [vmem:[%s4304_s29 + $0x4] sm:$0xf]  ;;  %v4313_v10 = vld [vmem:[%s4304_s29 + $0x8] sm:$0x1] }
  0x1a   : > { %3795 = vmatpush3.bf16.msra.mxu0 %v4108_v4  ;;  %v298_v11 = vshrl.u32 %v4307_v8, 16  ;;  %v301_v12 = vshll.u32 %v4307_v8, 16  ;;  %v307_v13 = vshll.u32 %v4310_v9, 16  ;;  %v311_v14 = vshrl.u32 %v4310_v9, 16  ;;  %v3336_v15 = vld [vmem:[%s4304_s29 + $0xc] sm:$0xf] }
  0x1b   : > { %3699 = vmatpush3.bf16.msra.mxu1 %v4109_v5  ;;  %3796 = vmatprep.subr.bf16.mxu0 %v4110_v6  ;;  %v317_v16 = vshll.u32 %v4313_v10, 16  ;;  %v4322_v17 = vld [vmem:[%s4304_s29 + $0x10] sm:$0xf]  ;;  %v4325_v18 = vld [vmem:[%s4304_s29 + $0x14] sm:$0x1]  ;;  %v1382_v25 = vshrl.u32 %v3336_v15, 16 }
  0x1c   : > { %3700 = vmatprep.subr.bf16.mxu1 %v4111_v7  ;;  %v300_v20 = vrot.slane %v298_v11, 4  ;;  %v303_v21 = vrot.slane %v301_v12, 5  ;;  %v309_v22 = vrot.slane %v307_v13, 5  ;;  %v313_v23 = vrot.slane %v311_v14, 4  ;;  %v4336_v32 = vld [vmem:[%s4304_s29 + $0xc] sm:$0xf] }
  0x1d   : > { %v319_v24 = vrot.slane %v317_v16, 5  ;;  %v1385_v26 = vshll.u32 %v3336_v15, 16  ;;  %v1391_v27 = vshll.u32 %v4322_v17, 16  ;;  %v1395_v30 = vshrl.u32 %v4322_v17, 16  ;;  %v4346_v37 = vld [vmem:[%s4304_s29 + $0x10] sm:$0xf] }
  0x1e   : > { %3797 = vmatpush3.bf16.msra.mxu0 %v4110_v6  ;;  %v304_v28 = vor.u32 %v303_v21, %v300_v20  ;;  %v314_v29 = vor.u32 %v313_v23, %v309_v22  ;;  %v1401_v31 = vshll.u32 %v4325_v18, 16  ;;  %v1384_v34 = vrot.slane %v1382_v25, 4  ;;  %v4349_v43 = vld [vmem:[%s4304_s29 + $0x14] sm:$0x1]  ;;  %v3339_v54 = vld [vmem:[%s4304_s29 + $0x18] sm:$0xf] }
  0x1f   : > { %3701 = vmatpush3.bf16.msra.mxu1 %v4111_v7  ;;  %v1387_v35 = vrot.slane %v1385_v26, 5  ;;  %v1393_v36 = vrot.slane %v1391_v27, 5  ;;  %3814 = vmatprep.subr.bf16.mxu0 %v4330_v19  ;;  %v1397_v40 = vrot.slane %v1395_v30, 4  ;;  %v322_v44 = vshrl.u32 %v4336_v32, 16  ;;  %v4367_v60 = vld [vmem:[%s4304_s29 + $0x1c] sm:$0xf] }
  0x20   : > { %v305_v38 = vrot.slane %v304_v28, 4  ;;  %v315_v39 = vrot.slane %v314_v29, 4  ;;  %v1403_v42 = vrot.slane %v1401_v31, 5  ;;  %v325_v45 = vshll.u32 %v4336_v32, 16  ;;  %v4374_v0 = vld [vmem:[%s4304_s29 + $0x20] sm:$0x1]  ;;  %3718 = vmatprep.subr.bf16.mxu1 %v4362_v55 }
  0x21   : > { %v1388_v41 = vor.u32 %v1387_v35, %v1384_v34  ;;  %v1398_v48 = vor.u32 %v1397_v40, %v1393_v36  ;;  %v331_v49 = vshll.u32 %v4346_v37, 16  ;;  %v324_v52 = vrot.slane %v322_v44, 4  ;;  %v4383_v16 = vld [vmem:[%s4304_s29 + $0x18] sm:$0xf]  ;;  %v288_v31 = vld [vmem:[%s4304_s29 + $0x20] sm:$0x1] }
  0x22   : > { %v310_v46 = vsel %vm4340_vm2, %v305_v38, %v309_v22  ;;  %v320_v47 = vsel %vm4340_vm2, %v315_v39, %v319_v24  ;;  %v327_v53 = vrot.slane %v325_v45, 5  ;;  %v335_v58 = vshrl.u32 %v4346_v37, 16  ;;  %v4390_v24 = vld [vmem:[%s4304_s29 + $0x1c] sm:$0xf]  ;;  %v4577_v30 = vld [vmem:[%s4304_s29 + $0x54] sm:$0xf] }
  0x23   : > { %v3216_v50 = vcombine.low %v310_v46, %v320_v47  ;;  %v1389_v51 = vrot.slane %v1388_v41, 4  ;;  %v1399_v56 = vrot.slane %v1398_v48, 4  ;;  %v333_v57 = vrot.slane %v331_v49, 5  ;;  %v3342_v41 = vld [vmem:[%s4304_s29 + $0x24] sm:$0xf]  ;;  %v4116_v48 = vld [vmem:[%s5289_s1 + $0x8] sm:$0xff]  }
  0x24   : > { %v341_v59 = vshll.u32 %v4349_v43, 16  ;;  %v328_v63 = vor.u32 %v327_v53, %v324_v52  ;;  %v337_v2 = vrot.slane %v335_v58, 4  ;;  %v1406_v4 = vshrl.u32 %v3339_v54, 16  ;;  %v4403_v47 = vld [vmem:[%s4304_s29 + $0x28] sm:$0xf]  ;;  %5302 = vst [vmem:[#allocation3_spill] sm:$0xff] %v4577_v30 }
  0x25   : > { %3702 = vmatprep.mubr.msk.bf16.mxu1 %vm546_vm3, %v3216_v50  ;;  %v1394_v61 = vsel %vm4340_vm2, %v1389_v51, %v1393_v36  ;;  %v1404_v1 = vsel %vm4340_vm2, %v1399_v56, %v1403_v42  ;;  %v1409_v7 = vshll.u32 %v3339_v54, 16  ;;  %v1415_v11 = vshll.u32 %v4367_v60, 16  ;;  %v4412_v56 = vld [vmem:[%s4304_s29 + $0x2c] sm:$0x1]  ;;  %v4608_v20 = vld [vmem:[%s4304_s29 + $0x68] sm:$0x1] }
  0x26   : > { %v343_v3 = vrot.slane %v341_v59, 5  ;;  %v3368_v5 = vcombine.low %v1394_v61, %v1404_v1  ;;  %v329_v6 = vrot.slane %v328_v63, 4  ;;  %v338_v12 = vor.u32 %v337_v2, %v333_v57  ;;  %v4113_v59 = vld [vmem:[%s5289_s1 + $0xa8] sm:$0xff]   ;;  %v4418_v61 = vld [vmem:[%s4304_s29 + $0x24] sm:$0xf]  ;;  %s3207_s27 = sshll.u32 %s258_s26, 3 }
  0x27   : > { %v1408_v13 = vrot.slane %v1406_v4, 4  ;;  %v1419_v14 = vshrl.u32 %v4367_v60, 16  ;;  %v1425_v15 = vshll.u32 %v4374_v0, 16  ;;  %v1411_v22 = vrot.slane %v1409_v7, 5  ;;  %v4424_v4 = vld [vmem:[%s4304_s29 + $0x28] sm:$0xf]  ;;  %s260_s6 = scalar_lea.vmem %s5293_s5, %s3207_s27 }
  0x28   : > { %3798 = vmatprep.mubr.msk.bf16.mxu0 %vm546_vm3, %v3368_v5  ;;  %v334_v21 = vsel %vm4340_vm2, %v329_v6, %v333_v57  ;;  %v1417_v23 = vrot.slane %v1415_v11, 5  ;;  %v339_v25 = vrot.slane %v338_v12, 4  ;;  %v346_v34 = vshrl.u32 %v4383_v16, 16  ;;  %v4118_v12 = vld [vmem:[%s5289_s1 + $0x10] sm:$0xff]  }
  0x29   : > { %v1421_v26 = vrot.slane %v1419_v14, 4  ;;  %v1427_v27 = vrot.slane %v1425_v15, 5  ;;  %v1412_v29 = vor.u32 %v1411_v22, %v1408_v13  ;;  %v349_v35 = vshll.u32 %v4383_v16, 16  ;;  %v4433_v22 = vld [vmem:[%s4304_s29 + $0x2c] sm:$0x1] }
  0x2a   : > { %v344_v36 = vsel %vm4340_vm2, %v339_v25, %v343_v3  ;;  %v355_v39 = vshll.u32 %v4390_v24, 16  ;;  %v359_v40 = vshrl.u32 %v4390_v24, 16  ;;  %v348_v45 = vrot.slane %v346_v34, 4 }
  0x2b   : > { %v1422_v38 = vor.u32 %v1421_v26, %v1417_v23  ;;  %v3217_v42 = vcombine.low %v334_v21, %v344_v36  ;;  %v1413_v44 = vrot.slane %v1412_v29, 4  ;;  %v351_v46 = vrot.slane %v349_v35, 5  ;;  %v4442_v29 = vld [vmem:[%s4304_s29 + $0x34] sm:$0xf] }
  0x2c   : > { %v357_v50 = vrot.slane %v355_v39, 5  ;;  %v361_v51 = vrot.slane %v359_v40, 4  ;;  %v365_v52 = vshll.u32 %v288_v31, 16  ;;  %v1430_v57 = vshrl.u32 %v3342_v41, 16 }
  0x2d   : > { %v1423_v49 = vrot.slane %v1422_v38, 4  ;;  %3703 = vmatmul.mubr.msk.bf16.vlgmr.msra.gmra.mrb[0].mxu1 %vm546_vm3, %v3217_v42  ;;  %v1418_v53 = vsel %vm4340_vm2, %v1413_v44, %v1417_v23  ;;  %v352_v54 = vor.u32 %v351_v46, %v348_v45  ;;  %v1433_v58 = vshll.u32 %v3342_v41, 16  ;;  %v4114_v38 = vld [vmem:[%s5289_s1 + $0xb0] sm:$0xff]  }
  0x2e   : > { %v362_v1 = vor.u32 %v361_v51, %v357_v50  ;;  %v367_v2 = vrot.slane %v365_v52, 5  ;;  %v1439_v3 = vshll.u32 %v4403_v47, 16  ;;  %3719 = vmatpush3.bf16.msra.mxu1 %v4362_v55  ;;  %v1432_v7 = vrot.slane %v1430_v57, 4  ;;  %v4460_v51 = vld [vmem:[%s4304_s29 + $0x38] sm:$0x1] }
  0x2f   : > { %v1428_v63 = vsel %vm4340_vm2, %v1423_v49, %v1427_v27  ;;  %v353_v6 = vrot.slane %v352_v54, 4  ;;  %v1435_v11 = vrot.slane %v1433_v58, 5  ;;  %3720 = vmatprep.subr.bf16.mxu1 %v4116_v48  ;;  %v1443_v15 = vshrl.u32 %v4403_v47, 16  ;;  %v3345_v27 = vld [vmem:[%s4304_s29 + $0x30] sm:$0xf]  ;;  %v4117_v57 = vld [vmem:[%s5289_s1 + $0xb8] sm:$0xff]  }
  0x30   : > { %v3369_v5 = vcombine.low %v1418_v53, %v1428_v63  ;;  %v363_v13 = vrot.slane %v362_v1, 4  ;;  %v1441_v14 = vrot.slane %v1439_v3, 5  ;;  %v1449_v21 = vshll.u32 %v4412_v56, 16  ;;  %v4463_v54 = vld [vmem:[%s4304_s29 + $0x30] sm:$0xf] }
  0x31   : > { %v358_v55 = vsel %vm4340_vm2, %v353_v6, %v357_v50  ;;  %v1436_v23 = vor.u32 %v1435_v11, %v1432_v7  ;;  %v370_v25 = vshrl.u32 %v4418_v61, 16  ;;  %v373_v26 = vshll.u32 %v4418_v61, 16 }
  0x32   : > { %3799 = vmatmul.mubr.msk.bf16.vlgmr.msra.gmra.mrb[0].mxu0 %vm546_vm3, %v3369_v5  ;;  %v368_v31 = vsel %vm4340_vm2, %v363_v13, %v367_v2  ;;  %v1445_v34 = vrot.slane %v1443_v15, 4  ;;  %v1451_v35 = vrot.slane %v1449_v21, 5  ;;  %v379_v36 = vshll.u32 %v4424_v4, 16  ;;  %3721 = vmatpush3.bf16.msra.mxu1 %v4116_v48  ;;  %v4474_v21 = vld [vmem:[%s4304_s29 + $0x34] sm:$0xf] }
  0x33   : > { %3815 = vmatpush3.bf16.msra.mxu0 %v4330_v19  ;;  %v3218_v39 = vcombine.low %v358_v55, %v368_v31  ;;  %v1437_v40 = vrot.slane %v1436_v23, 4  ;;  %v372_v41 = vrot.slane %v370_v25, 4  ;;  %v375_v42 = vrot.slane %v373_v26, 5  ;;  %3722 = vmatprep.subr.bf16.mxu1 %v4118_v12  ;;  %v4119_v19 = vld [vmem:[%s5289_s1 + $0x18] sm:$0xff]  }
  0x34   : > { %3816 = vmatprep.subr.bf16.mxu0 %v4113_v59  ;;  %v1446_v44 = vor.u32 %v1445_v34, %v1441_v14  ;;  %v381_v45 = vrot.slane %v379_v36, 5  ;;  %v383_v46 = vshrl.u32 %v4424_v4, 16  ;;  %v389_v49 = vshll.u32 %v4433_v22, 16  ;;  %v4484_v26 = vld [vmem:[%s4304_s29 + $0x38] sm:$0x1] }
  0x35   : > { %3706 = vmatprep.mubr.msk.bf16.mxu1 %vm546_vm3, %v3218_v39  ;;  %v1442_v48 = vsel %vm4340_vm2, %v1437_v40, %v1441_v14  ;;  %v376_v50 = vor.u32 %v375_v42, %v372_v41  ;;  %v1454_v52 = vshrl.u32 %v3345_v27, 16  ;;  %v1457_v53 = vshll.u32 %v3345_v27, 16  ;;  %v3348_v36 = vld [vmem:[%s4304_s29 + $0x3c] sm:$0xf] }
  0x36   : > { %v1447_v58 = vrot.slane %v1446_v44, 4  ;;  %v385_v63 = vrot.slane %v383_v46, 4  ;;  %v391_v1 = vrot.slane %v389_v49, 5  ;;  %v1463_v2 = vshll.u32 %v4442_v29, 16  ;;  %3723 = vmatpush3.bf16.msra.mxu1 %v4118_v12  ;;  %v4493_v44 = vld [vmem:[%s4304_s29 + $0x40] sm:$0xf] }
  0x37   : > { %3817 = vmatpush3.bf16.msra.mxu0 %v4113_v59  ;;  %v377_v3 = vrot.slane %v376_v50, 4  ;;  %v1456_v5 = vrot.slane %v1454_v52, 4  ;;  %v1459_v6 = vrot.slane %v1457_v53, 5  ;;  %v1467_v7 = vshrl.u32 %v4442_v29, 16  ;;  %3724 = vmatprep.subr.bf16.mxu1 %v4119_v19  ;;  %v4479_v59 = vld [vmem:[%s5289_s1 + $0x40] sm:$0xff]  }
  0x38   : > { %3818 = vmatprep.subr.bf16.mxu0 %v4114_v38  ;;  %v1452_v11 = vsel %vm4340_vm2, %v1447_v58, %v1451_v35  ;;  %v386_v13 = vor.u32 %v385_v63, %v381_v45  ;;  %v1465_v14 = vrot.slane %v1463_v2, 5  ;;  %v1473_v15 = vshll.u32 %v4460_v51, 16  ;;  %v4507_v58 = vld [vmem:[%s4304_s29 + $0x44] sm:$0x1] }
  0x39   : > { %v3370_v12 = vcombine.low %v1442_v48, %v1452_v11  ;;  %v382_v55 = vsel %vm4340_vm2, %v377_v3, %v381_v45  ;;  %v1460_v23 = vor.u32 %v1459_v6, %v1456_v5  ;;  %v1469_v25 = vrot.slane %v1467_v7, 4  ;;  %v4498_v45 = vld [vmem:[%s5289_s1 + $0xc0] sm:$0xff]  }
  0x3a   : > { %v387_v27 = vrot.slane %v386_v13, 4  ;;  %v1475_v31 = vrot.slane %v1473_v15, 5  ;;  %v394_v34 = vshrl.u32 %v4463_v54, 16  ;;  %v397_v35 = vshll.u32 %v4463_v54, 16  ;;  %3725 = vmatpush3.bf16.msra.mxu1 %v4119_v19 }
  0x3b   : > { %3819 = vmatpush3.bf16.msra.mxu0 %v4114_v38  ;;  %3802 = vmatprep.mubr.msk.bf16.mxu0 %vm546_vm3, %v3370_v12  ;;  %v1461_v39 = vrot.slane %v1460_v23, 4  ;;  %v1470_v40 = vor.u32 %v1469_v25, %v1465_v14  ;;  %v403_v41 = vshll.u32 %v4474_v21, 16  ;;  %v407_v42 = vshrl.u32 %v4474_v21, 16 }
  0x3c   : > { %3820 = vmatprep.subr.bf16.mxu0 %v4117_v57  ;;  %v392_v38 = vsel %vm4340_vm2, %v387_v27, %v391_v1  ;;  %v396_v19 = vrot.slane %v394_v34, 4  ;;  %v399_v46 = vrot.slane %v397_v35, 5  ;;  %v413_v49 = vshll.u32 %v4484_v26, 16  ;;  %3742 = vmatprep.subr.bf16.mxu1 %v4479_v59  ;;  %v4510_v1 = vld [vmem:[%s4304_s29 + $0x3c] sm:$0xf] }
  0x3d   : > { %v3219_v48 = vcombine.low %v382_v55, %v392_v38  ;;  %v1466_v50 = vsel %vm4340_vm2, %v1461_v39, %v1465_v14  ;;  %v1471_v52 = vrot.slane %v1470_v40, 4  ;;  %v405_v53 = vrot.slane %v403_v41, 5  ;;  %v4518_v14 = vld [vmem:[%s4304_s29 + $0x40] sm:$0xf]  ;;  %v4523_v34 = vld [vmem:[%s4304_s29 + $0x44] sm:$0x1] }
  0x3e   : > { %v400_v63 = vor.u32 %v399_v46, %v396_v19  ;;  %v409_v2 = vrot.slane %v407_v42, 4  ;;  %v415_v3 = vrot.slane %v413_v49, 5  ;;  %v1478_v5 = vshrl.u32 %v3348_v36, 16  ;;  %v3351_v41 = vld [vmem:[%s4304_s29 + $0x48] sm:$0xf] }
  0x3f   : > { %3821 = vmatpush3.bf16.msra.mxu0 %v4117_v57  ;;  %3707 = vmatmul.mubr.msk.bf16.gmra.mrb[4].mxu1 %vm546_vm3, %v3219_v48  ;;  %v1476_v6 = vsel %vm4340_vm2, %v1471_v52, %v1475_v31  ;;  %v1481_v7 = vshll.u32 %v3348_v36, 16  ;;  %v1487_v11 = vshll.u32 %v4493_v44, 16  ;;  %v1491_v13 = vshrl.u32 %v4493_v44, 16  ;;  %v4533_v49 = vld [vmem:[%s4304_s29 + $0x4c] sm:$0xf] }
  0x40   : > { %3838 = vmatprep.subr.bf16.mxu0 %v4498_v45  ;;  %v3371_v15 = vcombine.low %v1466_v50, %v1476_v6  ;;  %v401_v12 = vrot.slane %v400_v63, 4  ;;  %v410_v55 = vor.u32 %v409_v2, %v405_v53  ;;  %v1480_v57 = vrot.slane %v1478_v5, 4 }
  0x41   : > { %v1483_v23 = vrot.slane %v1481_v7, 5  ;;  %v1489_v25 = vrot.slane %v1487_v11, 5  ;;  %v1493_v27 = vrot.slane %v1491_v13, 4  ;;  %v1497_v31 = vshll.u32 %v4507_v58, 16  ;;  %v4539_v7 = vld [vmem:[%s4304_s29 + $0x50] sm:$0x1] }
  0x42   : > { %3803 = vmatmul.mubr.msk.bf16.gmra.mrb[4].mxu0 %vm546_vm3, %v3371_v15  ;;  %v406_v35 = vsel %vm4340_vm2, %v401_v12, %v405_v53  ;;  %v411_v36 = vrot.slane %v410_v55, 4  ;;  %v418_v39 = vshrl.u32 %v4510_v1, 16  ;;  %v421_v40 = vshll.u32 %v4510_v1, 16 }
  0x43   : > { %v1484_v42 = vor.u32 %v1483_v23, %v1480_v57  ;;  %v1494_v38 = vor.u32 %v1493_v27, %v1489_v25  ;;  %v1499_v19 = vrot.slane %v1497_v31, 5  ;;  %v427_v46 = vshll.u32 %v4518_v14, 16  ;;  %v4549_v27 = vld [vmem:[%s4304_s29 + $0x48] sm:$0xf] }
  0x44   : > { %v416_v48 = vsel %vm4340_vm2, %v411_v36, %v415_v3  ;;  %v420_v50 = vrot.slane %v418_v39, 4  ;;  %v423_v52 = vrot.slane %v421_v40, 5  ;;  %v431_v53 = vshrl.u32 %v4518_v14, 16  ;;  %v4552_v40 = vld [vmem:[%s4304_s29 + $0x4c] sm:$0xf] }
  0x45   : > { %v3220_v63 = vcombine.low %v406_v35, %v416_v48  ;;  %v1485_v2 = vrot.slane %v1484_v42, 4  ;;  %v1495_v5 = vrot.slane %v1494_v38, 4  ;;  %v429_v6 = vrot.slane %v427_v46, 5  ;;  %v4556_v48 = vld [vmem:[%s4304_s29 + $0x50] sm:$0x1] }
  0x46   : > { %v424_v11 = vor.u32 %v423_v52, %v420_v50  ;;  %v433_v13 = vrot.slane %v431_v53, 4  ;;  %v437_v15 = vshll.u32 %v4523_v34, 16  ;;  %v1502_v12 = vshrl.u32 %v3351_v41, 16  ;;  %5301 = vst [vmem:[#allocation2_spill] sm:$0xff] %v4556_v48  ;;  %v3354_v53 = vld [vmem:[%s4304_s29 + $0x54] sm:$0xf] }
  0x47   : > { %3710 = vmatprep.mubr.msk.bf16.mxu1 %vm546_vm3, %v3220_v63  ;;  %v1490_v3 = vsel %vm4340_vm2, %v1485_v2, %v1489_v25  ;;  %v1500_v55 = vsel %vm4340_vm2, %v1495_v5, %v1499_v19  ;;  %v1505_v57 = vshll.u32 %v3351_v41, 16  ;;  %v1511_v23 = vshll.u32 %v4533_v49, 16 }
  0x48   : > { %v3372_v31 = vcombine.low %v1490_v3, %v1500_v55  ;;  %v425_v35 = vrot.slane %v424_v11, 4  ;;  %v434_v36 = vor.u32 %v433_v13, %v429_v6  ;;  %v439_v39 = vrot.slane %v437_v15, 5  ;;  %v4567_v13 = vld [vmem:[%s4304_s29 + $0x58] sm:$0xf] }
  0x49   : > { %v1504_v42 = vrot.slane %v1502_v12, 4  ;;  %v1507_v38 = vrot.slane %v1505_v57, 5  ;;  %v1513_v46 = vrot.slane %v1511_v23, 5  ;;  %v1515_v25 = vshrl.u32 %v4533_v49, 16 }
  0x4a   : > { %3806 = vmatprep.mubr.msk.bf16.mxu0 %vm546_vm3, %v3372_v31  ;;  %v430_v41 = vsel %vm4340_vm2, %v425_v35, %v429_v6  ;;  %v435_v19 = vrot.slane %v434_v36, 4  ;;  %v1521_v50 = vshll.u32 %v4539_v7, 16  ;;  %v442_v52 = vshrl.u32 %v4549_v27, 16  ;;  %v4573_v35 = vld [vmem:[%s4304_s29 + $0x5c] sm:$0x1] }
  0x4b   : > { %v1508_v63 = vor.u32 %v1507_v38, %v1504_v42  ;;  %v1517_v2 = vrot.slane %v1515_v25, 4  ;;  %v445_v5 = vshll.u32 %v4549_v27, 16  ;;  %v451_v11 = vshll.u32 %v4552_v40, 16 }
  0x4c   : > { %v440_v15 = vsel %vm4340_vm2, %v435_v19, %v439_v39  ;;  %v1523_v6 = vrot.slane %v1521_v50, 5  ;;  %v444_v12 = vrot.slane %v442_v52, 4  ;;  %v455_v3 = vshrl.u32 %v4552_v40, 16  ;;  %v4583_v52 = vld [vmem:[%s4304_s29 + $0x58] sm:$0xf] }
  0x4d   : > { %v3221_v55 = vcombine.low %v430_v41, %v440_v15  ;;  %v1509_v57 = vrot.slane %v1508_v63, 4  ;;  %v1518_v23 = vor.u32 %v1517_v2, %v1513_v46  ;;  %v447_v31 = vrot.slane %v445_v5, 5  ;;  %5303 = vst [vmem:[#allocation4_spill] sm:$0xff] %v4583_v52 }
  0x4e   : > { %v453_v36 = vrot.slane %v451_v11, 5  ;;  %v457_v42 = vrot.slane %v455_v3, 4  ;;  %v461_v38 = vshll.u32 %v4556_v48, 16  ;;  %v1526_v25 = vshrl.u32 %v3354_v53, 16 }
  0x4f   : > { %3711 = vmatmul.mubr.msk.bf16.gmra.mrb[8].mxu1 %vm546_vm3, %v3221_v55  ;;  %v1514_v39 = vsel %vm4340_vm2, %v1509_v57, %v1513_v46  ;;  %v1519_v19 = vrot.slane %v1518_v23, 4  ;;  %v448_v41 = vor.u32 %v447_v31, %v444_v12  ;;  %v1529_v50 = vshll.u32 %v3354_v53, 16  ;;  %v4590_v57 = vld [vmem:[%s4304_s29 + $0x5c] sm:$0x1] }
  0x50   : > { %v458_v63 = vor.u32 %v457_v42, %v453_v36  ;;  %v463_v2 = vrot.slane %v461_v38, 5  ;;  %v1528_v5 = vrot.slane %v1526_v25, 4  ;;  %v1535_v11 = vshll.u32 %v4567_v13, 16  ;;  %5304 = vst [vmem:[#allocation5_spill] sm:$0xff] %v4590_v57  ;;  %v3357_v42 = vld [vmem:[%s4304_s29 + $0x60] sm:$0xf] }
  0x51   : > { %v1524_v15 = vsel %vm4340_vm2, %v1519_v19, %v1523_v6  ;;  %v449_v3 = vrot.slane %v448_v41, 4  ;;  %v1531_v55 = vrot.slane %v1529_v50, 5  ;;  %v1539_v46 = vshrl.u32 %v4567_v13, 16 }
  0x52   : > { %v3373_v53 = vcombine.low %v1514_v39, %v1524_v15  ;;  %v459_v12 = vrot.slane %v458_v63, 4  ;;  %v1537_v23 = vrot.slane %v1535_v11, 5  ;;  %v1545_v31 = vshll.u32 %v4573_v35, 16 }
  0x53   : > { %v454_v38 = vsel %vm4340_vm2, %v449_v3, %v453_v36  ;;  %v1532_v25 = vor.u32 %v1531_v55, %v1528_v5  ;;  %v1541_v28 = vrot.slane %v1539_v46, 4  ;;  %v466_v6 = vshrl.u32 %v4577_v30, 16  ;;  %v4603_v5 = vld [vmem:[%s4304_s29 + $0x64] sm:$0xf] }
  0x54   : > { %3807 = vmatmul.mubr.msk.bf16.gmra.mrb[8].mxu0 %vm546_vm3, %v3373_v53  ;;  %v464_v19 = vsel %vm4340_vm2, %v459_v12, %v463_v2  ;;  %v1547_v39 = vrot.slane %v1545_v31, 5  ;;  %v469_v41 = vshll.u32 %v4577_v30, 16  ;;  %v475_v50 = vshll.u32 %v4583_v52, 16 }
  0x55   : > { %v3222_v63 = vcombine.low %v454_v38, %v464_v19  ;;  %v1533_v11 = vrot.slane %v1532_v25, 4  ;;  %v1542_v15 = vor.u32 %v1541_v28, %v1537_v23  ;;  %v468_v36 = vrot.slane %v466_v6, 4  ;;  %v3388_v28 = vld [vmem:[%s4304_s29 + $0xc] sm:$0xe] }
  0x56   : > { %v471_v3 = vrot.slane %v469_v41, 5  ;;  %v477_v55 = vrot.slane %v475_v50, 5  ;;  %v479_v46 = vshrl.u32 %v4583_v52, 16  ;;  %v485_v53 = vshll.u32 %v4590_v57, 16 }
  0x57   : > { %3714 = vmatprep.mubr.msk.bf16.mxu1 %vm546_vm3, %v3222_v63  ;;  %v1538_v2 = vsel %vm4340_vm2, %v1533_v11, %v1537_v23  ;;  %v1543_v12 = vrot.slane %v1542_v15, 4  ;;  %v1550_v31 = vshrl.u32 %v3357_v42, 16  ;;  %v1553_v38 = vshll.u32 %v3357_v42, 16  ;;  %v3018_v42 = vld [vmem:[%s5292_s4 + $0x8] sm:$0xff] }
  0x58   : > { %v472_v25 = vor.u32 %v471_v3, %v468_v36  ;;  %v481_v6 = vrot.slane %v479_v46, 4  ;;  %v487_v19 = vrot.slane %v485_v53, 5  ;;  %v1559_v41 = vshll.u32 %v4603_v5, 16 }
  0x59   : > { %v1548_v50 = vsel %vm4340_vm2, %v1543_v12, %v1547_v39  ;;  %v1552_v62 = vrot.slane %v1550_v31, 4  ;;  %v1555_v30 = vrot.slane %v1553_v38, 5  ;;  %v1563_v57 = vshrl.u32 %v4603_v5, 16 }
  0x5a   : > { %v3374_v63 = vcombine.low %v1538_v2, %v1548_v50  ;;  %v473_v52 = vrot.slane %v472_v25, 4  ;;  %v482_v48 = vor.u32 %v481_v6, %v477_v55  ;;  %v1561_v23 = vrot.slane %v1559_v41, 5  ;;  %v3390_v25 = vld [vmem:[%s4304_s29 + $0x24] sm:$0xe] }
  0x5b   : > { %v1556_v11 = vor.u32 %v1555_v30, %v1552_v62  ;;  %v1565_v15 = vrot.slane %v1563_v57, 4  ;;  %v1569_v39 = vshll.u32 %v4608_v20, 16  ;;  %v3396_v36 = vrot.slane %v3388_v28, 9  ;;  %v3389_v28 = vld [vmem:[%s4304_s29 + $0x18] sm:$0xe] }
  0x5c   : > { %3810 = vmatprep.mubr.msk.bf16.mxu0 %vm546_vm3, %v3374_v63  ;;  %v478_v3 = vsel %vm4340_vm2, %v473_v52, %v477_v55  ;;  %v483_v46 = vrot.slane %v482_v48, 4  ;;  %v5307_v53 = vrot.slane %v4322_v17, 5  ;;  %v3237_v12 = vcombine.low %v4336_v32, %v4346_v37 }
  0x5d   : > { %v1557_v31 = vrot.slane %v1556_v11, 4  ;;  %v1566_v38 = vor.u32 %v1565_v15, %v1561_v23  ;;  %v1571_v62 = vrot.slane %v1569_v39, 5  ;;  %v3236_v48 = vcombine.low %v4307_v8, %v4310_v9  ;;  %v3391_v15 = vld [vmem:[%s4304_s29 + $0x30] sm:$0xe] }
  0x5e   : > { %v1803_v2 = vrot.slane %v5307_v53, 4  ;;  %v5308_v30 = vmov %v5307_v53  ;;  %v488_v52 = vsel %vm4340_vm2, %v483_v46, %v487_v19  ;;  %v5309_v55 = vrot.slane %v4325_v18, 5  ;;  %v3392_v46 = vld [vmem:[%s4304_s29 + $0x3c] sm:$0xe] }
  0x5f   : > { %v1802_v57 = vsel %vm4620_vm6, %v3396_v36, %v5308_v30  ;;  %v3223_v6 = vcombine.low %v478_v3, %v488_v52  ;;  %v1562_v17 = vsel %vm4340_vm2, %v1557_v31, %v1561_v23  ;;  %v1567_v41 = vrot.slane %v1566_v38, 4 }
  0x60   : > { %v1805_v32 = vsel %vm4620_vm6, %v1803_v2, %v5309_v55  ;;  %v5310_v63 = vrot.slane %v4367_v60, 5  ;;  %v1815_v19 = vrot.slane %v4403_v47, 5  ;;  %v3397_v9 = vrot.slane %v3389_v28, 9 }
  0x61   : > { %v3412_v50 = vcombine.low %v1802_v57, %v1805_v32  ;;  %3715 = vmatmul.mubr.msk.bf16.gmra.mrb[12].mxu1 %vm546_vm3, %v3223_v6  ;;  %v1572_v8 = vsel %vm4340_vm2, %v1567_v41, %v1571_v62  ;;  %v3398_v18 = vrot.slane %v3390_v25, 9  ;;  %v1818_v36 = vrot.slane %v4412_v56, 5  ;;  %v4130_v57 = vld [vmem:[%s5289_s1 + $0x48] sm:$0xff]  }
  0x62   : > { %v1810_v11 = vrot.slane %v5310_v63, 4  ;;  %v3375_v39 = vcombine.low %v1562_v17, %v1572_v8  ;;  %3726 = vmatprep.mubr.msk.bf16.mxu1 %vm546_vm3, %v3236_v48  ;;  %v1817_v23 = vrot.slane %v1815_v19, 4  ;;  %v1822_v3 = vrot.slane %v4442_v29, 5  ;;  %v3394_v48 = vld [vmem:[%s4304_s29 + $0x54] sm:$0xe]  ;;  %v4124_v6 = vld [vmem:[%s5289_s1 + $0xc8] sm:$0xff]  }
  0x63   : > { %v5311_v47 = vrot.slane %v4374_v0, 5  ;;  %v3399_v2 = vrot.slane %v3391_v15, 9  ;;  %v1829_v31 = vrot.slane %v4493_v44, 5  ;;  %v5312_v38 = vmov %v5310_v63  ;;  %v3393_v0 = vld [vmem:[%s4304_s29 + $0x48] sm:$0xe]  ;;  %v4127_v15 = vld [vmem:[%s5289_s1 + $0xd0] sm:$0xff]  }
  0x64   : > { %3811 = vmatmul.mubr.msk.bf16.gmra.mrb[12].mxu0 %vm546_vm3, %v3375_v39  ;;  %v1809_v56 = vsel %vm4620_vm6, %v3397_v9, %v5312_v38  ;;  %v3238_v29 = vcombine.low %v4383_v16, %v4390_v24  ;;  %v1824_v62 = vrot.slane %v1822_v3, 4  ;;  %v1825_v30 = vrot.slane %v4460_v51, 5  ;;  %v854_v63 = vld [vmem:[%s4304_s29 + $0xc] sm:$0xe]  ;;  %v856_v9 = vld [vmem:[%s4304_s29 + $0x24] sm:$0xe] }
  0x65   : > { %v1812_v53 = vsel %vm4620_vm6, %v1810_v11, %v5311_v47  ;;  %3822 = vmatprep.mubr.msk.bf16.mxu0 %vm546_vm3, %v3412_v50  ;;  %v1816_v44 = vsel %vm4620_vm6, %v3398_v18, %v1815_v19  ;;  %v1819_v60 = vsel %vm4620_vm6, %v1817_v23, %v1818_v36  ;;  %v3400_v28 = vrot.slane %v3392_v46, 9  ;;  %v857_v23 = vld [vmem:[%s4304_s29 + $0x30] sm:$0xe]  ;;  %v4756_v38 = vld [vmem:[%s4304_s29 + $0x4] sm:$0xf] }
  0x66   : > { %v1832_v52 = vrot.slane %v4507_v58, 5  ;;  %v1831_v55 = vrot.slane %v1829_v31, 4  ;;  %v1836_v16 = vrot.slane %v4533_v49, 5  ;;  %v885_v24 = vrot.slane %v4313_v10, 5 }
  0x67   : > { %v889_v51 = vrot.slane %v4346_v37, 5  ;;  %v892_v32 = vrot.slane %v4349_v43, 5  ;;  %v3413_v25 = vcombine.low %v1809_v56, %v1812_v53  ;;  %v3414_v17 = vcombine.low %v1816_v44, %v1819_v60  ;;  %v4134_v43 = vld [vmem:[%s5289_s1 + $0x50] sm:$0xff]   ;;  %v4135_v44 = vld [vmem:[%s5289_s1 + $0x58] sm:$0xff]  }
  0x68   : > { %v4693_v58 = vsel %vm4620_vm6, %v3399_v2, %v1822_v3  ;;  %v4697_v49 = vsel %vm4620_vm6, %v1824_v62, %v1825_v30  ;;  %v1843_v37 = vrot.slane %v4567_v13, 5  ;;  %v3401_v41 = vrot.slane %v3393_v0, 9  ;;  %v4738_v3 = vld [vmem:[%s4304_s29] sm:$0xe]  ;;  %v859_v30 = vld [vmem:[%s4304_s29 + $0x48] sm:$0xe] }
  0x69   : > { %3727 = vmatmul.mubr.msk.bf16.vlgmr.msra.gmra.mrb[0].mxu1 %vm546_vm3, %v3237_v12  ;;  %v3239_v12 = vcombine.low %v4418_v61, %v4424_v4  ;;  %v3402_v50 = vrot.slane %v3394_v48, 9  ;;  %v4710_v11 = vsel %vm4620_vm6, %v3400_v28, %v1829_v31  ;;  %v4714_v13 = vsel %vm4620_vm6, %v1831_v55, %v1832_v52  ;;  %v4718_v61 = vld [vmem:[%s4304_s29 + $0x60] sm:$0xe]  ;;  %v858_v31 = vld [vmem:[%s4304_s29 + $0x3c] sm:$0xe] }
  0x6a   : > { %3730 = vmatprep.mubr.msk.bf16.mxu1 %vm546_vm3, %v3238_v29  ;;  %3743 = vmatpush3.bf16.msra.mxu1 %v4479_v59  ;;  %v1838_v19 = vrot.slane %v1836_v16, 4  ;;  %v1839_v8 = vrot.slane %v4539_v7, 5  ;;  %v3415_v59 = vcombine.low %v4693_v58, %v4697_v49  ;;  %v3240_v18 = vcombine.low %v4463_v54, %v4474_v21  ;;  %v4132_v48 = vld [vmem:[%s5289_s1 + $0xd8] sm:$0xff]  }
  0x6b   : > { %3744 = vmatprep.subr.bf16.mxu1 %v4130_v57  ;;  %v3241_v7 = vcombine.low %v4510_v1, %v4518_v14  ;;  %v3242_v39 = vcombine.low %v4549_v27, %v4552_v40  ;;  %v1845_v36 = vrot.slane %v1843_v37, 4  ;;  %v1846_v54 = vrot.slane %v4573_v35, 5 }
  0x6c   : > { %3823 = vmatmul.mubr.msk.bf16.vlgmr.msra.gmra.mrb[0].mxu0 %vm546_vm3, %v3413_v25  ;;  %v3257_v46 = vrot.slane %v854_v63, 9  ;;  %v891_v47 = vrot.slane %v889_v51, 4  ;;  %v3416_v53 = vcombine.low %v4710_v11, %v4714_v13  ;;  %v4744_v2 = vsel %vm4620_vm6, %v3401_v41, %v1836_v16  ;;  %v4821_v13 = vld [vmem:[%s5289_s1 + $0xe0] sm:$0xff]  }
  0x6d   : > { %3839 = vmatpush3.bf16.msra.mxu0 %v4498_v45  ;;  %3826 = vmatprep.mubr.msk.bf16.mxu0 %vm546_vm3, %v3414_v17  ;;  %v4748_v45 = vsel %vm4620_vm6, %v3402_v50, %v1843_v37  ;;  %v4753_v35 = vsel %vm4620_vm6, %v1838_v19, %v1839_v8  ;;  %v882_v56 = vrot.slane %v4756_v38, 5  ;;  %v3403_v0 = vrot.slane %v4718_v61, 9  ;;  %v5316_v38 = vld [vmem:[#allocation3_spill] sm:$0xff]  ;;  %v4136_v61 = vld [vmem:[%s4304_s29 + $0x18] sm:$0xff]  }
  0x6e   : > { %3840 = vmatprep.subr.bf16.mxu0 %v4124_v6  ;;  %3745 = vmatpush3.bf16.msra.mxu1 %v4130_v57  ;;  %v4761_v29 = vsel %vm4620_vm6, %v3257_v46, %v889_v51  ;;  %v4765_v62 = vsel %vm4620_vm6, %v891_v47, %v892_v32  ;;  %v1850_v57 = vrot.slane %v4603_v5, 5  ;;  %v3259_v28 = vrot.slane %v856_v9, 9  ;;  %v860_v32 = vld [vmem:[%s4304_s29 + $0x54] sm:$0xe]  ;;  %v5313_v9 = vld [vmem:[#allocation2_spill] sm:$0xff] }
  0x6f   : > { %3746 = vmatprep.subr.bf16.mxu1 %v4134_v43  ;;  %v3273_v60 = vcombine.low %v4761_v29, %v4765_v62  ;;  %v4778_v52 = vsel %vm4620_vm6, %v1845_v36, %v1846_v54  ;;  %v903_v55 = vrot.slane %v4424_v4, 5  ;;  %v906_v16 = vrot.slane %v4433_v22, 5  ;;  %v5314_v47 = vld [vmem:[#allocation4_spill] sm:$0xff]  ;;  %v3479_v29 = vld [vmem:[%s4304_s29 + $0x24] sm:$0xf] }
  0x70   : > { %v3260_v51 = vrot.slane %v857_v23, 9  ;;  %v3256_v25 = vrot.slane %v4738_v3, 9  ;;  %v913_v17 = vrot.slane %v4484_v26, 5  ;;  %v3261_v58 = vrot.slane %v858_v31, 9  ;;  %v5315_v31 = vld [vmem:[#allocation5_spill] sm:$0xff] }
  0x71   : > { %3731 = vmatmul.mubr.msk.bf16.gmra.mrb[4].mxu1 %vm546_vm3, %v3239_v12  ;;  %3841 = vmatpush3.bf16.msra.mxu0 %v4124_v6  ;;  %v910_v6 = vrot.slane %v4474_v21, 5  ;;  %v884_v49 = vrot.slane %v882_v56, 4  ;;  %v4794_v4 = vsel %vm4620_vm6, %v3259_v28, %v903_v55  ;;  %v905_v22 = vrot.slane %v903_v55, 4  ;;  %v4806_v12 = vld [vmem:[%s5289_s1 + $0x60] sm:$0xff]   ;;  %v4932_v62 = vld [vmem:[%s4304_s29 + $0x28] sm:$0xf] }
  0x72   : > { %3734 = vmatprep.mubr.msk.bf16.mxu1 %vm546_vm3, %v3240_v18  ;;  %3842 = vmatprep.subr.bf16.mxu0 %v4127_v15  ;;  %v917_v37 = vrot.slane %v4518_v14, 5  ;;  %v3262_v41 = vrot.slane %v859_v30, 9  ;;  %v3263_v18 = vrot.slane %v860_v32, 9  ;;  %v3417_v3 = vcombine.low %v4744_v2, %v4753_v35  ;;  %v4167_v32 = vld [vmem:[%s4304_s29 + $0x20] sm:$0x1] }
  0x73   : > { %3747 = vmatpush3.bf16.msra.mxu1 %v4134_v43  ;;  %v4800_v21 = vsel %vm4620_vm6, %v3260_v51, %v910_v6  ;;  %v912_v26 = vrot.slane %v910_v6, 4  ;;  %v920_v43 = vrot.slane %v4523_v34, 5  ;;  %v4811_v50 = vsel %vm4620_vm6, %v905_v22, %v906_v16  ;;  %v4139_v22 = vld [vmem:[%s4304_s29 + $0x30] sm:$0xff]  }
  0x74   : > { %3827 = vmatmul.mubr.msk.bf16.gmra.mrb[4].mxu0 %vm546_vm3, %v3415_v59  ;;  %3748 = vmatprep.subr.bf16.mxu1 %v4135_v44  ;;  %v4815_v63 = vsel %vm4620_vm6, %v3261_v58, %v917_v37  ;;  %v919_v11 = vrot.slane %v917_v37, 4  ;;  %v924_v34 = vrot.slane %v4552_v40, 5  ;;  %v3275_v19 = vcombine.low %v4794_v4, %v4811_v50  ;;  %v4166_v40 = vld [vmem:[%s4304_s29 + $0x1c] sm:$0xf]  ;;  %v4146_v58 = vld [vmem:[%s5289_s1 + $0x68] sm:$0xff]  }
  0x75   : > { %3830 = vmatprep.mubr.msk.bf16.mxu0 %vm546_vm3, %v3416_v53  ;;  %3843 = vmatpush3.bf16.msra.mxu0 %v4127_v15  ;;  %v4827_v8 = vsel %vm4620_vm6, %v912_v26, %v913_v17  ;;  %v927_v59 = vrot.slane %v5313_v9, 5  ;;  %v931_v53 = vrot.slane %v5314_v47, 5  ;;  %v934_v30 = vrot.slane %v5315_v31, 5  ;;  %v3476_v17 = vld [vmem:[%s4304_s29 + $0x18] sm:$0xf] }
  0x76   : > { %3844 = vmatprep.subr.bf16.mxu0 %v4132_v48  ;;  %v3276_v15 = vcombine.low %v4800_v21, %v4827_v8  ;;  %v4834_v23 = vsel %vm4620_vm6, %v919_v11, %v920_v43  ;;  %v4838_v36 = vsel %vm4620_vm6, %v3262_v41, %v924_v34  ;;  %v926_v54 = vrot.slane %v924_v34, 4  ;;  %v4920_v37 = vld [vmem:[%s4304_s29 + $0x1c] sm:$0xf]  ;;  %v4140_v41 = vld [vmem:[%s5289_s1 + $0xe8] sm:$0xff]   ;;  %v4149_v11 = vld [vmem:[%s5289_s1 + $0x70] sm:$0xff]  }
  0x77   : > { %3749 = vmatpush3.bf16.msra.mxu1 %v4135_v44  ;;  %v3277_v46 = vcombine.low %v4815_v63, %v4834_v23  ;;  %v3418_v44 = vcombine.low %v4748_v45, %v4778_v52  ;;  %v1852_v2 = vrot.slane %v1850_v57, 4  ;;  %v1853_v35 = vrot.slane %v4608_v20, 5  ;;  %v855_v45 = vld [vmem:[%s4304_s29 + $0x18] sm:$0xe] }
  0x78   : > { %3766 = vmatprep.subr.bf16.mxu1 %v4806_v12  ;;  %v4858_v28 = vsel %vm4620_vm6, %v926_v54, %v927_v59  ;;  %v4869_v14 = vsel %vm4620_vm6, %v3263_v18, %v931_v53  ;;  %v933_v20 = vrot.slane %v931_v53, 4  ;;  %v886_v27 = vsel %vm4620_vm6, %v884_v49, %v885_v24  ;;  %v4138_v49 = vld [vmem:[%s4304_s29 + $0x24] sm:$0xff]   ;;  %v4143_v59 = vld [vmem:[%s5289_s1 + $0xf0] sm:$0xff]   ;;  %v4151_v31 = vld [vmem:[%s5289_s1 + $0x78] sm:$0xff]  }
  0x79   : > { %3735 = vmatmul.mubr.msk.bf16.gmra.mrb[8].mxu1 %vm546_vm3, %v3241_v7  ;;  %3845 = vmatpush3.bf16.msra.mxu0 %v4132_v48  ;;  %v3278_v1 = vcombine.low %v4838_v36, %v4858_v28  ;;  %v883_v7 = vsel %vm4620_vm6, %v3256_v25, %v882_v56  ;;  %v3243_v56 = vcombine.low %v5316_v38, %v5314_v47  ;;  %v3258_v16 = vrot.slane %v855_v45, 9  ;;  %v4142_v53 = vld [vmem:[%s4304_s29 + $0x48] sm:$0xff]  }
  0x7a   : > { %3738 = vmatprep.mubr.msk.bf16.mxu1 %vm546_vm3, %v3242_v39  ;;  %3862 = vmatprep.subr.bf16.mxu0 %v4821_v13  ;;  %v896_v39 = vrot.slane %v4166_v40, 5  ;;  %v4884_v52 = vsel %vm4620_vm6, %v933_v20, %v934_v30  ;;  %v1851_v10 = vsel %vm4620_vm6, %v3403_v0, %v1850_v57  ;;  %v1854_v24 = vsel %vm4620_vm6, %v1852_v2, %v1853_v35  ;;  %v4148_v2 = vld [vmem:[%s5289_s1 + $0xf8] sm:$0xff]   ;;  %v4959_v35 = vld [vmem:[%s4304_s29 + $0x20] sm:$0x1] }
  0x7b   : > { %v3279_v48 = vcombine.low %v4869_v14, %v4884_v52  ;;  %v3272_v55 = vcombine.low %v883_v7, %v886_v27  ;;  %v899_v5 = vrot.slane %v4167_v32, 5  ;;  %v3419_v25 = vcombine.low %v1851_v10, %v1854_v24  ;;  %v3482_v7 = vld [vmem:[%s4304_s29 + $0x30] sm:$0xf]  ;;  %v4145_v10 = vld [vmem:[%s4304_s29 + $0x54] sm:$0xff]   ;;  %v3494_v52 = vld [vmem:[%s4304_s29 + $0x60] sm:$0xf] }
  0x7c   : > { %3831 = vmatmul.mubr.msk.bf16.gmra.mrb[8].mxu0 %vm546_vm3, %v3417_v3  ;;  %v898_v51 = vrot.slane %v896_v39, 4  ;;  %v897_v0 = vsel %vm4620_vm6, %v3258_v16, %v896_v39  ;;  %v2301_v26 = vshrl.u32 %v3476_v17, 16  ;;  %v2304_v43 = vshll.u32 %v3476_v17, 16  ;;  %v4972_v39 = vld [vmem:[%s4304_s29 + $0x2c] sm:$0x1] }
  0x7d   : > { %3834 = vmatprep.mubr.msk.bf16.mxu0 %vm546_vm3, %v3418_v44  ;;  %v2314_v34 = vshrl.u32 %v4920_v37, 16  ;;  %v2325_v18 = vshrl.u32 %v3479_v29, 16  ;;  %v2328_v54 = vshll.u32 %v3479_v29, 16  ;;  %v2334_v3 = vshll.u32 %v4932_v62, 16 }
  0x7e   : > { %v900_v57 = vsel %vm4620_vm6, %v898_v51, %v899_v5  ;;  %v2306_v9 = vrot.slane %v2304_v43, 5  ;;  %v2338_v47 = vshrl.u32 %v4932_v62, 16  ;;  %v2320_v8 = vshll.u32 %v4959_v35, 16  ;;  %v3485_v5 = vld [vmem:[%s4304_s29 + $0x3c] sm:$0xf] }
  0x7f   : > { %v3274_v6 = vcombine.low %v897_v0, %v900_v57  ;;  %v2316_v44 = vrot.slane %v2314_v34, 4  ;;  %v2327_v27 = vrot.slane %v2325_v18, 4  ;;  %v2330_v40 = vrot.slane %v2328_v54, 5  ;;  %v4994_v0 = vld [vmem:[%s4304_s29 + $0x40] sm:$0xf] }
  0x80   : > { %v4966_v4 = vrot.slane %v2334_v3, 5  ;;  %v2340_v50 = vrot.slane %v2338_v47, 4  ;;  %v2352_v45 = vshll.u32 %v3482_v7, 16  ;;  %v2344_v32 = vshll.u32 %v4972_v39, 16 }
  0x81   : > { %3739 = vmatmul.mubr.msk.bf16.gmra.mrb[12].mxu1 %vm546_vm3, %v3243_v56  ;;  %v2331_v16 = vor.u32 %v2330_v40, %v2327_v27  ;;  %v2373_v43 = vshrl.u32 %v3485_v5, 16  ;;  %v2386_v34 = vshrl.u32 %v4994_v0, 16  ;;  %v4150_v40 = vld [vmem:[%s4304_s29 + $0x6c] sm:$0xff]  }
  0x82   : > { %3750 = vmatprep.mubr.msk.bf16.mxu1 %vm546_vm3, %v3272_v55  ;;  %v4984_v55 = vld [vmem:[%s5289_s1 + $0x100] sm:$0xff]   ;;  %v2341_v51 = vor.u32 %v2340_v50, %v4966_v4 }
  0x83   : > { %v2332_v63 = vrot.slane %v2331_v16, 4  ;;  %v2375_v3 = vrot.slane %v2373_v43, 4 }
  0x84   : > { %3835 = vmatmul.mubr.msk.bf16.gmra.mrb[12].mxu0 %vm546_vm3, %v3419_v25  ;;  %v4147_v25 = vld [vmem:[%s4304_s29 + $0x60] sm:$0xff]   ;;  %v2342_v23 = vrot.slane %v2341_v51, 4 }
  0x85   : > { %3846 = vmatprep.mubr.msk.bf16.mxu0 %vm546_vm3, %v4136_v61  ;;  %v4991_v61 = vld [vmem:[%s4304_s29 + $0x38] sm:$0x1] }
  0x86   : > { %v2368_v28 = vshll.u32 %v4991_v61, 16 }
  0x89   : > { %3751 = vmatmul.mubr.msk.bf16.vlgmr.msra.gmra.mrb[0].mxu1 %vm546_vm3, %v3273_v60  ;;  %v2310_v60 = vshll.u32 %v4920_v37, 16 }
  0x8a   : > { %3754 = vmatprep.mubr.msk.bf16.mxu1 %vm546_vm3, %v3274_v6  ;;  %3767 = vmatpush3.bf16.msra.mxu1 %v4806_v12  ;;  %v2303_v12 = vrot.slane %v2301_v26, 4  ;;  %v2322_v6 = vrot.slane %v2320_v8, 5 }
  0x8b   : > { %3768 = vmatprep.subr.bf16.mxu1 %v4146_v58  ;;  %v4949_v30 = vrot.slane %v2310_v60, 5  ;;  %v2382_v60 = vshll.u32 %v4994_v0, 16 }
  0x8c   : > { %3847 = vmatmul.mubr.msk.bf16.vlgmr.msra.gmra.mrb[0].mxu0 %vm546_vm3, %v4138_v49  ;;  %v2307_v20 = vor.u32 %v2306_v9, %v2303_v12  ;;  %v3488_v49 = vld [vmem:[%s4304_s29 + $0x48] sm:$0xf] }
  0x8d   : > { %3863 = vmatpush3.bf16.msra.mxu0 %v4821_v13  ;;  %3850 = vmatprep.mubr.msk.bf16.mxu0 %vm546_vm3, %v4139_v22  ;;  %v4141_v13 = vld [vmem:[%s4304_s29 + $0x3c] sm:$0xff]   ;;  %v2317_v21 = vor.u32 %v2316_v44, %v4949_v30  ;;  %v2397_v12 = vshrl.u32 %v3488_v49, 16  ;;  %v2400_v9 = vshll.u32 %v3488_v49, 16  ;;  %v5033_v44 = vrot.slane %v2382_v60, 5 }
  0x8e   : > { %3864 = vmatprep.subr.bf16.mxu0 %v4140_v41  ;;  %3769 = vmatpush3.bf16.msra.mxu1 %v4146_v58  ;;  %v2308_v24 = vrot.slane %v2307_v20, 4  ;;  %v2354_v58 = vrot.slane %v2352_v45, 5  ;;  %v5036_v20 = vld [vmem:[%s4304_s29 + $0x50] sm:$0x1] }
  0x8f   : > { %3770 = vmatprep.subr.bf16.mxu1 %v4149_v11  ;;  %v2318_v57 = vrot.slane %v2317_v21, 4  ;;  %v2402_v27 = vrot.slane %v2400_v9, 5  ;;  %v2370_v21 = vrot.slane %v2368_v28, 5 }
  0x90   : > { %v2313_v29 = vsel %vm4340_vm2, %v2308_v24, %v4949_v30  ;;  %v5031_v30 = vld [vmem:[%s4304_s29 + $0x44] sm:$0x1]  ;;  %v5048_v24 = vld [vmem:[%s4304_s29 + $0x58] sm:$0xf] }
  0x91   : > { %3755 = vmatmul.mubr.msk.bf16.gmra.mrb[4].mxu1 %vm546_vm3, %v3275_v19  ;;  %3865 = vmatpush3.bf16.msra.mxu0 %v4140_v41  ;;  %v4969_v19 = vld [vmem:[%s4304_s29 + $0x34] sm:$0xf]  ;;  %v2376_v41 = vshll.u32 %v3485_v5, 16  ;;  %v2323_v36 = vsel %vm4340_vm2, %v2318_v57, %v2322_v6  ;;  %v2416_v5 = vshll.u32 %v5036_v20, 16  ;;  %v2430_v6 = vshll.u32 %v5048_v24, 16 }
  0x92   : > { %3758 = vmatprep.mubr.msk.bf16.mxu1 %vm546_vm3, %v3276_v15  ;;  %3866 = vmatprep.subr.bf16.mxu0 %v4143_v59  ;;  %v2349_v15 = vshrl.u32 %v3482_v7, 16  ;;  %v2358_v38 = vshll.u32 %v4969_v19, 16  ;;  %v2362_v56 = vshrl.u32 %v4969_v19, 16  ;;  %v2399_v7 = vrot.slane %v2397_v12, 4 }
  0x93   : > { %3771 = vmatpush3.bf16.msra.mxu1 %v4149_v11  ;;  %v5004_v11 = vld [vmem:[%s4304_s29 + $0x4c] sm:$0xf]  ;;  %v2378_v47 = vrot.slane %v2376_v41, 5  ;;  %v3508_v50 = vcombine.low %v2313_v29, %v2323_v36  ;;  %v4155_v29 = vld [vmem:[%s4304_s29 + $0x24] sm:$0xff]   ;;  %v2418_v9 = vrot.slane %v2416_v5, 5 }
  0x94   : > { %3851 = vmatmul.mubr.msk.bf16.gmra.mrb[4].mxu0 %vm546_vm3, %v4141_v13  ;;  %3772 = vmatprep.subr.bf16.mxu1 %v4151_v31  ;;  %v2351_v17 = vrot.slane %v2349_v15, 4  ;;  %v5001_v22 = vrot.slane %v2358_v38, 5  ;;  %v2364_v26 = vrot.slane %v2362_v56, 4  ;;  %v4152_v13 = vld [vmem:[%s4304_s29 + $0xc] sm:$0xff]   ;;  %v3491_v15 = vld [vmem:[%s4304_s29 + $0x54] sm:$0xf] }
  0x95   : > { %3854 = vmatprep.mubr.msk.bf16.mxu0 %vm546_vm3, %v4142_v53  ;;  %3867 = vmatpush3.bf16.msra.mxu0 %v4143_v59  ;;  %v2410_v59 = vshrl.u32 %v5004_v11, 16  ;;  %v2337_v53 = vsel %vm4340_vm2, %v2332_v63, %v4966_v4  ;;  %v2379_v56 = vor.u32 %v2378_v47, %v2375_v3  ;;  %v2421_v14 = vshrl.u32 %v3491_v15, 16  ;;  %v4156_v3 = vld [vmem:[%s5289_s1 + $0x108] sm:$0xff]  }
  0x96   : > { %3868 = vmatprep.subr.bf16.mxu0 %v4148_v2  ;;  %v2355_v18 = vor.u32 %v2354_v58, %v2351_v17  ;;  %v2365_v54 = vor.u32 %v2364_v26, %v5001_v22  ;;  %v2424_v57 = vshll.u32 %v3491_v15, 16  ;;  %v2434_v17 = vshrl.u32 %v5048_v24, 16  ;;  %v4154_v58 = vld [vmem:[%s4304_s29 + $0x18] sm:$0xff]   ;;  %v3497_v47 = vld [vmem:[%s4304_s29 + $0x6c] sm:$0xf] }
  0x97   : > { %3773 = vmatpush3.bf16.msra.mxu1 %v4151_v31  ;;  %v2412_v4 = vrot.slane %v2410_v59, 4  ;;  %v2380_v43 = vrot.slane %v2379_v56, 4  ;;  %v2445_v63 = vshrl.u32 %v3494_v52, 16  ;;  %v2423_v36 = vrot.slane %v2421_v14, 4 }
  0x98   : > { %v2356_v45 = vrot.slane %v2355_v18, 4  ;;  %v2366_v38 = vrot.slane %v2365_v54, 4  ;;  %v5074_v59 = vrot.slane %v2430_v6, 5  ;;  %v2436_v18 = vrot.slane %v2434_v17, 4 }
  0x99   : > { %3759 = vmatmul.mubr.msk.bf16.gmra.mrb[8].mxu1 %vm546_vm3, %v3277_v46  ;;  %3869 = vmatpush3.bf16.msra.mxu0 %v4148_v2  ;;  %v2346_v46 = vrot.slane %v2344_v32, 5  ;;  %v2388_v2 = vrot.slane %v2386_v34, 4  ;;  %v2403_v32 = vor.u32 %v2402_v27, %v2399_v7  ;;  %v5083_v7 = vld [vmem:[%s4304_s29 + $0x70] sm:$0xf]  ;;  %v2385_v27 = vsel %vm4340_vm2, %v2380_v43, %v5033_v44 }
  0x9a   : > { %3762 = vmatprep.mubr.msk.bf16.mxu1 %vm546_vm3, %v3278_v1  ;;  %3886 = vmatprep.subr.bf16.mxu0 %v4984_v55  ;;  %v2406_v1 = vshll.u32 %v5004_v11, 16  ;;  %v2361_v49 = vsel %vm4340_vm2, %v2356_v45, %v5001_v22  ;;  %v2371_v26 = vsel %vm4340_vm2, %v2366_v38, %v2370_v21  ;;  %v5072_v22 = vld [vmem:[%s4304_s29 + $0x5c] sm:$0x1]  ;;  %v5092_v21 = vld [vmem:[%s4304_s29 + $0x68] sm:$0x1]  ;;  %v4157_v38 = vld [vmem:[%s4304_s29 + $0x30] sm:$0xff]  }
  0x9b   : > { %v2347_v31 = vsel %vm4340_vm2, %v2342_v23, %v2346_v46  ;;  %v2389_v51 = vor.u32 %v2388_v2, %v5033_v44  ;;  %v2448_v23 = vshll.u32 %v3494_v52, 16  ;;  %v2404_v12 = vrot.slane %v2403_v32, 4  ;;  %v4158_v32 = vld [vmem:[%s4304_s29 + $0x3c] sm:$0xff]  }
  0x9c   : > { %3855 = vmatmul.mubr.msk.bf16.gmra.mrb[8].mxu0 %vm546_vm3, %v4145_v10  ;;  %v5039_v8 = vrot.slane %v2406_v1, 5  ;;  %v2392_v10 = vshll.u32 %v5031_v30, 16  ;;  %v3509_v16 = vcombine.low %v2337_v53, %v2347_v31  ;;  %v2426_v1 = vrot.slane %v2424_v57, 5 }
  0x9d   : > { %3858 = vmatprep.mubr.msk.bf16.mxu0 %vm546_vm3, %v4147_v25  ;;  %v2390_v34 = vrot.slane %v2389_v51, 4  ;;  %v3510_v54 = vcombine.low %v2361_v49, %v2371_v26  ;;  %v2450_v53 = vrot.slane %v2448_v23, 5  ;;  %v2437_v44 = vor.u32 %v2436_v18, %v5074_v59  ;;  %v4162_v23 = vld [vmem:[%s5289_s1 + $0x118] sm:$0xff]  }
  0x9e   : > { %v2413_v25 = vor.u32 %v2412_v4, %v5039_v8  ;;  %v2394_v41 = vrot.slane %v2392_v10, 5  ;;  %v2409_v4 = vsel %vm4340_vm2, %v2404_v12, %v5039_v8  ;;  %v2427_v45 = vor.u32 %v2426_v1, %v2423_v36  ;;  %v4159_v8 = vld [vmem:[%s5289_s1 + $0x110] sm:$0xff]  }
  0x9f   : > { %v2469_v56 = vshrl.u32 %v3497_v47, 16  ;;  %v2472_v10 = vshll.u32 %v3497_v47, 16  ;;  %v2478_v51 = vshll.u32 %v5083_v7, 16  ;;  %v2464_v52 = vshll.u32 %v5092_v21, 16  ;;  %v4161_v1 = vld [vmem:[%s4304_s29 + $0x54] sm:$0xff]  }
  0xa0   : > { %v2414_v28 = vrot.slane %v2413_v25, 4  ;;  %v2428_v57 = vrot.slane %v2427_v45, 4  ;;  %v2438_v6 = vrot.slane %v2437_v44, 4  ;;  %v2727_v45 = vrot.slane %v4932_v62, 5 }
  0xa1   : > { %3763 = vmatmul.mubr.msk.bf16.gmra.mrb[12].mxu1 %vm546_vm3, %v3279_v48  ;;  %v5055_v48 = vld [vmem:[%s4304_s29 + $0x64] sm:$0xf]  ;;  %v2474_v49 = vrot.slane %v2472_v10, 5  ;;  %v2480_v26 = vrot.slane %v2478_v51, 5  ;;  %v3530_v10 = vld [vmem:[%s4304_s29 + $0x30] sm:$0xe] }
  0xa2   : > { %3774 = vmatprep.mubr.msk.bf16.mxu1 %vm546_vm3, %v4152_v13  ;;  %v2454_v46 = vshll.u32 %v5055_v48, 16  ;;  %v2458_v60 = vshrl.u32 %v5055_v48, 16  ;;  %v2447_v13 = vrot.slane %v2445_v63, 4  ;;  %v2419_v15 = vsel %vm4340_vm2, %v2414_v28, %v2418_v9 }
  0xa3   : > { %v3512_v25 = vcombine.low %v2409_v4, %v2419_v15  ;;  %v2466_v63 = vrot.slane %v2464_v52, 5  ;;  %v2730_v62 = vrot.slane %v4972_v39, 5 }
  0xa4   : > { %3859 = vmatmul.mubr.msk.bf16.gmra.mrb[12].mxu0 %vm546_vm3, %v4150_v40  ;;  %v2456_v31 = vrot.slane %v2454_v46, 5  ;;  %v2460_v2 = vrot.slane %v2458_v60, 4  ;;  %v2395_v40 = vsel %vm4340_vm2, %v2390_v34, %v2394_v41  ;;  %v2451_v5 = vor.u32 %v2450_v53, %v2447_v13  ;;  %v5117_v46 = vld [vmem:[%s4304_s29 + $0x74] sm:$0x1]  ;;  %v4160_v34 = vld [vmem:[%s4304_s29 + $0x48] sm:$0xff]  }
  0xa5   : > { %3870 = vmatprep.mubr.msk.bf16.mxu0 %vm546_vm3, %v3508_v50  ;;  %v2440_v50 = vshll.u32 %v5072_v22, 16  ;;  %v2433_v60 = vsel %vm4340_vm2, %v2428_v57, %v5074_v59  ;;  %v2488_v28 = vshll.u32 %v5117_v46, 16  ;;  %v2720_v59 = vrot.slane %v4920_v37, 5  ;;  %v4163_v37 = vld [vmem:[%s4304_s29 + $0x60] sm:$0xff]   ;;  %v3531_v57 = vld [vmem:[%s4304_s29 + $0x3c] sm:$0xe] }
  0xa6   : > { %v2461_v14 = vor.u32 %v2460_v2, %v2456_v31  ;;  %v2452_v41 = vrot.slane %v2451_v5, 4 }
  0xa7   : > { %v2442_v17 = vrot.slane %v2440_v50, 5  ;;  %v2723_v50 = vrot.slane %v4959_v35, 5  ;;  %v3529_v35 = vld [vmem:[%s4304_s29 + $0x24] sm:$0xe] }
  0xa8   : > { %v2457_v18 = vsel %vm4340_vm2, %v2452_v41, %v2456_v31  ;;  %v3537_v33 = vrot.slane %v3529_v35, 9 }
  0xa9   : > { %3775 = vmatmul.mubr.msk.bf16.vlgmr.msra.gmra.mrb[0].mxu1 %vm546_vm3, %v4154_v58  ;;  %v2471_v58 = vrot.slane %v2469_v56, 4  ;;  %v2443_v12 = vsel %vm4340_vm2, %v2438_v6, %v2442_v17  ;;  %v2734_v56 = vrot.slane %v4969_v19, 5  ;;  %v3532_v6 = vld [vmem:[%s4304_s29 + $0x48] sm:$0xe] }
  0xaa   : > { %3778 = vmatprep.mubr.msk.bf16.mxu1 %vm546_vm3, %v4155_v29  ;;  %v2462_v29 = vrot.slane %v2461_v14, 4  ;;  %v3513_v47 = vcombine.low %v2433_v60, %v2443_v12  ;;  %v2737_v14 = vrot.slane %v4991_v61, 5  ;;  %v2728_v19 = vsel %vm4620_vm6, %v3537_v33, %v2727_v45  ;;  %v3534_v12 = vld [vmem:[%s4304_s29 + $0x60] sm:$0xe] }
  0xab   : > { %v2475_v9 = vor.u32 %v2474_v49, %v2471_v58  ;;  %v2736_v5 = vrot.slane %v2734_v56, 4  ;;  %v2748_v61 = vrot.slane %v5004_v11, 5  ;;  %v3539_v49 = vrot.slane %v3531_v57, 9 }
  0xac   : > { %3871 = vmatmul.mubr.msk.bf16.vlgmr.msra.gmra.mrb[0].mxu0 %vm546_vm3, %v3509_v16  ;;  %v2482_v16 = vshrl.u32 %v5083_v7, 16  ;;  %v3540_v41 = vrot.slane %v3532_v6, 9 }
  0xad   : > { %3887 = vmatpush3.bf16.msra.mxu0 %v4984_v55  ;;  %3874 = vmatprep.mubr.msk.bf16.mxu0 %vm546_vm3, %v3510_v54  ;;  %v3511_v55 = vcombine.low %v2385_v27, %v2395_v40  ;;  %v2467_v54 = vsel %vm4340_vm2, %v2462_v29, %v2466_v63  ;;  %v2476_v53 = vrot.slane %v2475_v9, 4  ;;  %v2490_v27 = vrot.slane %v2488_v28, 5 }
  0xae   : > { %3888 = vmatprep.subr.bf16.mxu0 %v4156_v3  ;;  %v2484_v43 = vrot.slane %v2482_v16, 4  ;;  %v3514_v13 = vcombine.low %v2457_v18, %v2467_v54  ;;  %v2722_v40 = vrot.slane %v2720_v59, 4  ;;  %v2738_v39 = vsel %vm4620_vm6, %v2736_v5, %v2737_v14 }
  0xaf   : > { %v2481_v4 = vsel %vm4340_vm2, %v2476_v53, %v2480_v26  ;;  %v2751_v29 = vrot.slane %v5036_v20, 5  ;;  %v2749_v60 = vsel %vm4620_vm6, %v3540_v41, %v2748_v61  ;;  %v2762_v20 = vrot.slane %v5055_v48, 5  ;;  %v3535_v53 = vld [vmem:[%s4304_s29 + $0x6c] sm:$0xe] }
  0xb0   : > { %v2485_v36 = vor.u32 %v2484_v43, %v2480_v26  ;;  %v2744_v43 = vrot.slane %v5031_v30, 5  ;;  %v2758_v18 = vrot.slane %v5072_v22, 5  ;;  %v3542_v54 = vrot.slane %v3534_v12, 9 }
  0xb1   : > { %3779 = vmatmul.mubr.msk.bf16.gmra.mrb[4].mxu1 %vm546_vm3, %v4157_v38  ;;  %3889 = vmatpush3.bf16.msra.mxu0 %v4156_v3  ;;  %v3528_v3 = vld [vmem:[%s4304_s29 + $0x18] sm:$0xe]  ;;  %v2724_v38 = vsel %vm4620_vm6, %v2722_v40, %v2723_v50  ;;  %v2772_v40 = vrot.slane %v5117_v46, 5  ;;  %v3017_v46 = vld [vmem:[%s5292_s4] sm:$0xff] }
  0xb2   : > { %3782 = vmatprep.mubr.msk.bf16.mxu1 %vm546_vm3, %v4158_v32  ;;  %3890 = vmatprep.subr.bf16.mxu0 %v4159_v8  ;;  %v2486_v2 = vrot.slane %v2485_v36, 4  ;;  %v3536_v31 = vrot.slane %v3528_v3, 9  ;;  %v2729_v32 = vrot.slane %v2727_v45, 4 }
  0xb4   : > { %3875 = vmatmul.mubr.msk.bf16.gmra.mrb[4].mxu0 %vm546_vm3, %v3511_v55  ;;  %v2491_v15 = vsel %vm4340_vm2, %v2486_v2, %v2490_v27  ;;  %v2721_v44 = vsel %vm4620_vm6, %v3536_v31, %v2720_v59  ;;  %v2731_v52 = vsel %vm4620_vm6, %v2729_v32, %v2730_v62  ;;  %v2741_v55 = vrot.slane %v4994_v0, 5 }
  0xb5   : > { %3878 = vmatprep.mubr.msk.bf16.mxu0 %vm546_vm3, %v3512_v25  ;;  %3891 = vmatpush3.bf16.msra.mxu0 %v4159_v8  ;;  %v3515_v51 = vcombine.low %v2481_v4, %v2491_v15  ;;  %v3552_v16 = vcombine.low %v2721_v44, %v2724_v38  ;;  %v3538_v8 = vrot.slane %v3530_v10, 9  ;;  %v3553_v17 = vcombine.low %v2728_v19, %v2731_v52 }
  0xb6   : > { %3892 = vmatprep.subr.bf16.mxu0 %v4162_v23  ;;  %v2743_v26 = vrot.slane %v2741_v55, 4  ;;  %v2750_v0 = vrot.slane %v2748_v61, 4  ;;  %v2742_v11 = vsel %vm4620_vm6, %v3539_v49, %v2741_v55  ;;  %v2764_v59 = vrot.slane %v2762_v20, 4 }
  0xb7   : > { %v2735_v25 = vsel %vm4620_vm6, %v3538_v8, %v2734_v56  ;;  %v3543_v27 = vrot.slane %v3535_v53, 9  ;;  %v4208_v4 = vmov 0.0   ;;  %v4210_v15 = vmov 0  }
  0xb8   : > { %v3554_v58 = vcombine.low %v2735_v25, %v2738_v39  ;;  %v2745_v63 = vsel %vm4620_vm6, %v2743_v26, %v2744_v43  ;;  %v2752_v30 = vsel %vm4620_vm6, %v2750_v0, %v2751_v29  ;;  %3910 = vmatprep.subr.bf16.mxu1 %v4208_v4  ;;  %4103 = vset.pattern.permute.xlu0 %v4210_v15  ;;  %v5227_v25 = vld [vmem:[%s5290_s2] ss:$0 sm:$0xff] }
  0xb9   : > { %3783 = vmatmul.mubr.msk.bf16.gmra.mrb[8].mxu1 %vm546_vm3, %v4160_v34  ;;  %3893 = vmatpush3.bf16.msra.mxu0 %v4162_v23  ;;  %v2755_v23 = vrot.slane %v5048_v24, 5  ;;  %v3533_v34 = vld [vmem:[%s4304_s29 + $0x54] sm:$0xe]  ;;  %v3555_v9 = vcombine.low %v2742_v11, %v2745_v63  ;;  %v3556_v36 = vcombine.low %v2749_v60, %v2752_v30  ;;  %v2765_v24 = vrot.slane %v5092_v21, 5 }
  0xba   : > { %3786 = vmatprep.mubr.msk.bf16.mxu1 %vm546_vm3, %v4161_v1  ;;  %v3541_v28 = vrot.slane %v3533_v34, 9  ;;  %3021 = vperm.xlu0 %4103, %v3017_v46  }
  0xbb   : > { %v2757_v1 = vrot.slane %v2755_v23, 4  ;;  %v2766_v22 = vsel %vm4620_vm6, %v2764_v59, %v2765_v24 }
  0xbc   : > { %3879 = vmatmul.mubr.msk.bf16.gmra.mrb[8].mxu0 %vm546_vm3, %v3513_v47  ;;  %v2756_v3 = vsel %vm4620_vm6, %v3541_v28, %v2755_v23  ;;  %v2769_v47 = vrot.slane %v5083_v7, 5 }
  0xbd   : > { %3882 = vmatprep.mubr.msk.bf16.mxu0 %vm546_vm3, %v3514_v13  ;;  %v2759_v48 = vsel %vm4620_vm6, %v2757_v1, %v2758_v18  ;;  %v2763_v13 = vsel %vm4620_vm6, %v3542_v54, %v2762_v20 }
  0xbe   : > { %v3557_v21 = vcombine.low %v2756_v3, %v2759_v48  ;;  %v3558_v2 = vcombine.low %v2763_v13, %v2766_v22  ;;  %v2771_v31 = vrot.slane %v2769_v47, 4  ;;  %v2770_v7 = vsel %vm4620_vm6, %v3543_v27, %v2769_v47  ;;  %3026 = vperm.xlu0 %4103, %v3018_v42  }
  0xc0   : > { %v2773_v50 = vsel %vm4620_vm6, %v2771_v31, %v2772_v40 }
  0xc1   : > { %3787 = vmatmul.mubr.msk.bf16.gmra.mrb[12].mxu1 %vm546_vm3, %v4163_v37  ;;  %v3559_v37 = vcombine.low %v2770_v7, %v2773_v50 }
  0xc2   : > { %3926 = vmatprep.mubr.msk.bf16.mxu1 %vm4209_vm7, %v4208_v4 }
  0xc4   : > { %3883 = vmatmul.mubr.msk.bf16.gmra.mrb[12].mxu0 %vm546_vm3, %v3515_v51 }
  0xc5   : > { %3894 = vmatprep.mubr.msk.bf16.mxu0 %vm546_vm3, %v3552_v16 }
  0xcc   : > { %3895 = vmatmul.mubr.msk.bf16.vlgmr.msra.gmra.mrb[0].mxu0 %vm546_vm3, %v3553_v17 }
  0xcd   : > { %3898 = vmatprep.mubr.msk.bf16.mxu0 %vm546_vm3, %v3554_v58 }
  0xd4   : > { %3899 = vmatmul.mubr.msk.bf16.gmra.mrb[4].mxu0 %vm546_vm3, %v3555_v9 }
  0xd5   : > { %3902 = vmatprep.mubr.msk.bf16.mxu0 %vm546_vm3, %v3556_v36 }
  0xdc   : > { %3903 = vmatmul.mubr.msk.bf16.gmra.mrb[8].mxu0 %vm546_vm3, %v3557_v21 }
  0xdd   : > { %3906 = vmatprep.mubr.msk.bf16.mxu0 %vm546_vm3, %v3558_v2 }
  0xe4   : > { %3907 = vmatmul.mubr.msk.bf16.gmra.mrb[12].mxu0 %vm546_vm3, %v3559_v37 }
 0x17c   : > { %v3776_v45 = vpop.f32.mrb[0].mxu1 }
 0x17d   : > { %v1278_v44 = vpop.f32.mrb[1].mxu1 }
 0x17e   : > { %v3777_v38 = vpop.f32.mrb[2].mxu1 }
 0x17f   : > { %v1281_v35 = vpop.f32.mrb[3].mxu1 }
 0x184   : > { %v3780_v56 = vpop.f32.mrb[4].mxu1 }
 0x185   : > { %v1294_v10 = vpop.f32.mrb[5].mxu1 }
 0x186   : > { %v3781_v51 = vpop.f32.mrb[6].mxu1 }
 0x187   : > { %v1297_v16 = vpop.f32.mrb[7].mxu1 }
 0x18c   : > { %v3784_v33 = vpop.f32.mrb[8].mxu1 }
 0x18d   : > { %v1310_v32 = vpop.f32.mrb[9].mxu1 }
 0x18e   : > { %v3785_v62 = vpop.f32.mrb[10].mxu1 }
 0x18f   : > { %v1313_v8 = vpop.f32.mrb[11].mxu1 }
 0x194   : > { %v5216_v5 = vpop.f32.mrb[12].mxu1 }
 0x195   : > { %v5218_v14 = vpop.f32.mrb[13].mxu1 }
 0x196   : > { %v5220_v19 = vpop.f32.mrb[14].mxu1 }
 0x197   : > { %v5222_v52 = vpop.f32.mrb[15].mxu1 }
 0x19f   : > { %v3896_v55 = vpop.f32.mrb[0].mxu0 }
 0x1a0   : > { %v3930_v39 = vadd.f32 %v3896_v55, %v3776_v45  ;;  %v2889_v57 = vpop.f32.mrb[1].mxu0 }
 0x1a1   : > { %v3931_v61 = vadd.f32 %v2889_v57, %v1278_v44  ;;  %v3897_v6 = vpop.f32.mrb[2].mxu0 }
 0x1a2   : > { %v2977_v17 = vadd.f32 %v3930_v39, %v5227_v25  ;;  %v3932_v58 = vadd.f32 %v3897_v6, %v3777_v38  ;;  %v2892_v49 = vpop.f32.mrb[3].mxu0 }
 0x1a3   : > { %v2975_v26 = vadd.f32 %v3931_v61, %v5227_v25  ;;  %v3933_v43 = vadd.f32 %v2892_v49, %v1281_v35 }
 0x1a4   : > { %v2978_v41 = vadd.f32 %v3932_v58, %v5227_v25  ;;  %v2993_v29 = vmax.f32 %v2977_v17, 0.0 }
 0x1a5   : > { %v2976_v0 = vadd.f32 %v3933_v43, %v5227_v25  ;;  %v2991_v63 = vmax.f32 %v2975_v26, 0.0 }
 0x1a6   : > { %v2994_v11 = vmax.f32 %v2978_v41, 0.0 }
 0x1a7   : > { %v2992_v23 = vmax.f32 %v2976_v0, 0.0  ;;  %v3900_v60 = vpop.f32.mrb[4].mxu0 }
 0x1a8   : > { %v3008_v30 = vpack.c.bf16 %v2994_v11, %v2993_v29  ;;  %v3934_v34 = vadd.f32 %v3900_v60, %v3780_v56  ;;  %v2905_v20 = vpop.f32.mrb[5].mxu0 }
 0x1a9   : > { %v3007_v12 = vpack.c.bf16 %v2992_v23, %v2991_v63  ;;  %v3935_v9 = vadd.f32 %v2905_v20, %v1294_v10  ;;  %v3901_v36 = vpop.f32.mrb[6].mxu0 }
 0x1aa   : > { %v2981_v28 = vadd.f32 %v3934_v34, %v5227_v25  ;;  %v3936_v1 = vadd.f32 %v3901_v36, %v3781_v51  ;;  %v2908_v18 = vpop.f32.mrb[7].mxu0  ;;  %v3041_v44 = vsel %vm546_vm3, %v3008_v30, 0  ;;  %v4164_v30 = vld [vmem:[%s5291_s3] sm:$0xff]   ;;  %v3022_v34 = vpop.permute.xlu0 %3021 }
 0x1ab   : > { %v2979_v54 = vadd.f32 %v3935_v9, %v5227_v25  ;;  %v3937_v59 = vadd.f32 %v2908_v18, %v1297_v16  ;;  %v3038_v24 = vsel %vm546_vm3, %v3007_v12, 0 }
 0x1ac   : > { %v2982_v3 = vadd.f32 %v3936_v1, %v5227_v25  ;;  %3911 = vmatpush3.bf16.xpose.msra.mxu1 %v3038_v24  ;;  %v2997_v47 = vmax.f32 %v2981_v28, 0.0 }
 0x1ad   : > { %v2980_v48 = vadd.f32 %v3937_v59, %v5227_v25  ;;  %3912 = vmatprep.subr.bf16.mxu1 %v4208_v4  ;;  %v2995_v22 = vmax.f32 %v2979_v54, 0.0 }
 0x1ae   : > { %v2998_v13 = vmax.f32 %v2982_v3, 0.0  ;;  %v3027_v9 = vpop.permute.xlu0 %3026 }
 0x1af   : > { %v2996_v53 = vmax.f32 %v2980_v48, 0.0  ;;  %v3904_v21 = vpop.f32.mrb[8].mxu0 }
 0x1b0   : > { %v3010_v2 = vpack.c.bf16 %v2998_v13, %v2997_v47  ;;  %v3938_v27 = vadd.f32 %v3904_v21, %v3784_v33  ;;  %v2921_v31 = vpop.f32.mrb[9].mxu0 }
 0x1b1   : > { %v3009_v40 = vpack.c.bf16 %v2996_v53, %v2995_v22  ;;  %v3939_v7 = vadd.f32 %v2921_v31, %v1310_v32  ;;  %v3905_v50 = vpop.f32.mrb[10].mxu0 }
 0x1b2   : > { %v2985_v37 = vadd.f32 %v3938_v27, %v5227_v25  ;;  %v3940_v46 = vadd.f32 %v3905_v50, %v3785_v62  ;;  %v2924_v15 = vpop.f32.mrb[11].mxu0  ;;  %v3047_v63 = vsel %vm546_vm3, %v3010_v2, 0 }
 0x1b3   : > { %v2983_v42 = vadd.f32 %v3939_v7, %v5227_v25  ;;  %v3941_v45 = vadd.f32 %v2924_v15, %v1313_v8  ;;  %v3044_v26 = vsel %vm546_vm3, %v3009_v40, 0 }
 0x1b4   : > { %v2986_v38 = vadd.f32 %v3940_v46, %v5227_v25  ;;  %3913 = vmatpush3.bf16.xpose.msra.mxu1 %v3041_v44  ;;  %v3001_v56 = vmax.f32 %v2985_v37, 0.0 }
 0x1b5   : > { %v2984_v35 = vadd.f32 %v3941_v45, %v5227_v25  ;;  %3914 = vmatprep.subr.bf16.mxu1 %v4208_v4  ;;  %v2999_v51 = vmax.f32 %v2983_v42, 0.0 }
 0x1b6   : > { %v3002_v10 = vmax.f32 %v2986_v38, 0.0 }
 0x1b7   : > { %v3000_v16 = vmax.f32 %v2984_v35, 0.0  ;;  %v3908_v33 = vpop.f32.mrb[12].mxu0 }
 0x1b8   : > { %v3012_v32 = vpack.c.bf16 %v3002_v10, %v3001_v56  ;;  %v3942_v62 = vadd.f32 %v3908_v33, %v5216_v5  ;;  %v2937_v55 = vpop.f32.mrb[13].mxu0 }
 0x1b9   : > { %v3011_v39 = vpack.c.bf16 %v3000_v16, %v2999_v51  ;;  %v3943_v8 = vadd.f32 %v2937_v55, %v5218_v14  ;;  %v3909_v57 = vpop.f32.mrb[14].mxu0 }
 0x1ba   : > { %v2989_v61 = vadd.f32 %v3942_v62, %v5227_v25  ;;  %v3944_v6 = vadd.f32 %v3909_v57, %v5220_v19  ;;  %v2940_v17 = vpop.f32.mrb[15].mxu0 }
 0x1bb   : > { %v2987_v58 = vadd.f32 %v3943_v8, %v5227_v25  ;;  %v3945_v49 = vadd.f32 %v2940_v17, %v5222_v52  ;;  %v3050_v52 = vsel %vm546_vm3, %v3011_v39, 0 }
 0x1bc   : > { %v2990_v43 = vadd.f32 %v3944_v6, %v5227_v25  ;;  %3915 = vmatpush3.bf16.xpose.msra.mxu1 %v3044_v26  ;;  %v3005_v14 = vmax.f32 %v2989_v61, 0.0 }
 0x1bd   : > { %v2988_v5 = vadd.f32 %v3945_v49, %v5227_v25  ;;  %3916 = vmatprep.subr.bf16.mxu1 %v4208_v4  ;;  %v3003_v0 = vmax.f32 %v2987_v58, 0.0  ;;  %v3053_v25 = vsel %vm546_vm3, %v3012_v32, 0 }
 0x1be   : > { %v3006_v41 = vmax.f32 %v2990_v43, 0.0 }
 0x1bf   : > { %v3004_v29 = vmax.f32 %v2988_v5, 0.0 }
 0x1c0   : > { %v3014_v11 = vpack.c.bf16 %v3006_v41, %v3005_v14 }
 0x1c1   : > { %v3013_v19 = vpack.c.bf16 %v3004_v29, %v3003_v0 }
 0x1c2   : > { %v3059_v60 = vsel %vm546_vm3, %v3014_v11, 0 }
 0x1c3   : > { %v3056_v23 = vsel %vm546_vm3, %v3013_v19, 0 }
 0x1c4   : > { %3917 = vmatpush3.bf16.xpose.msra.mxu1 %v3047_v63 }
 0x1c5   : > { %3918 = vmatprep.subr.bf16.mxu1 %v4208_v4 }
 0x1cc   : > { %3919 = vmatpush3.bf16.xpose.msra.mxu1 %v3050_v52 }
 0x1cd   : > { %3920 = vmatprep.subr.bf16.mxu1 %v4208_v4 }
 0x1d4   : > { %3921 = vmatpush3.bf16.xpose.msra.mxu1 %v3053_v25 }
 0x1d5   : > { %3922 = vmatprep.subr.bf16.mxu1 %v4208_v4 }
 0x1dc   : > { %3923 = vmatpush3.bf16.xpose.msra.mxu1 %v3056_v23 }
 0x1dd   : > { %3924 = vmatprep.subr.bf16.mxu1 %v4208_v4 }
 0x1e4   : > { %3925 = vmatpush3.bf16.xpose.msra.mxu1 %v3059_v60 }
 0x1eb   : > { %3927 = vmatmul.mubr.msk.bf16.vlgmr.msra.gmra.mrb[16].mxu1 %vm546_vm3, %v4164_v30 }
 0x2be   : > { %v3095_v20 = vpop.f32.mrb[16].mxu1 }
 0x2bf   : > { %v3096_v4 = vadd.f32 %v3095_v20, %v3022_v34  ;;  %v3928_v12 = vpop.f32.mrb[17].mxu1 }
 0x2c0   : > { %v3098_v36 = vpop.f32.mrb[18].mxu1 }
 0x2c1   : > { %3102 = vst [vmem:[%s260_s6] sm:$0xff] %v3096_v4  ;;  %v3099_v28 = vadd.f32 %v3098_v36, %v3027_v9  ;;  %v3929_v1 = vpop.f32.mrb[19].mxu1 }
 0x2c3   : > { %3103 = vst [vmem:[%s260_s6 + $0x8] sm:$0xff] %v3099_v28 }
 0x2c4 PF: > { %s15_s22 = sadd.s32 1, %s4206_s22   ;;  %s5317_s18 = smov %s4198_s20 }
 0x2c5   : > { %p12_p7 = scmp.ge.s32.totalorder %s15_s22, 6   ;;  %s5318_s19 = smov %s4202_s21 }
 0x2c6   : > { %s5319_s20 = smov %s5322_s23  ;;  %s5320_s21 = smov %s5326_s24 }
 0x2c7   :  { %14 = sbr.rel (!%p12_p7) target bundleno = 3 (0x3), region = 80 }

</bundles_post_ra>
